<compile_context>
chip_gen: v5e
topology: v5e:2x2
jax: 0.10.0
libtpu: 0.0.40
codegen_flags: <defaults>
</compile_context>

<pallas_src>
import functools
import math

import jax
import jax.numpy as jnp
from jax.experimental import pallas as pl
from jax.experimental.pallas import tpu as pltpu

LN_EPS = 1e-5  # torch.nn.LayerNorm default


# ---------------------------------------------------------------------------
# in-kernel helpers (f32 math)
# ---------------------------------------------------------------------------
def _layernorm(x, g, b):
    mu = jnp.mean(x, axis=-1, keepdims=True)
    var = jnp.mean((x - mu) ** 2, axis=-1, keepdims=True)
    return (x - mu) * jax.lax.rsqrt(var + LN_EPS) * g + b


def _new_gelu(x):
    c = math.sqrt(2.0 / math.pi)
    return 0.5 * x * (1.0 + jnp.tanh(c * (x + 0.044715 * x ** 3)))


# ---------------------------------------------------------------------------
# one grid step = one (batch row, layer) pair.  The activation is carried in a
# VMEM scratch across the (inner, "arbitrary") depth axis.
# ---------------------------------------------------------------------------
def transformer_kernel(x_ref, wqkv_ref, bqkv_ref, wo_ref, bo_ref,
                       ln1g_ref, ln1b_ref, wf1_ref, bf1_ref, wf2_ref, bf2_ref,
                       ln2g_ref, ln2b_ref, o_ref, xc_ref, *, num_heads, scale):
    layer = pl.program_id(1)

    # Load this batch row into the VMEM carry at the first layer.
    @pl.when(layer == 0)
    def _():
        xc_ref[...] = x_ref[0].astype(jnp.float32)

    x = xc_ref[...]                                   # (N, E) f32 carry
    N, E = x.shape
    d = E // num_heads

    # ---------------- attention ----------------
    xb = x.astype(jnp.bfloat16)
    # fused QKV: one full-width (N,E)@(E,3E) bf16 matmul, f32 accumulation
    qkv = jnp.dot(xb, wqkv_ref[0], preferred_element_type=jnp.float32) + bqkv_ref[0]

    head_outs = []
    for h in range(num_heads):                        # static lane slices of qkv
        qh = qkv[:, h * d:(h + 1) * d].astype(jnp.bfloat16)
        kh = qkv[:, E + h * d:E + (h + 1) * d].astype(jnp.bfloat16)
        vh = qkv[:, 2 * E + h * d:2 * E + (h + 1) * d].astype(jnp.bfloat16)
        dots = jax.lax.dot_general(
            qh, kh, (((1,), (1,)), ((), ())),
            preferred_element_type=jnp.float32) * scale            # (N, N)
        dots = dots - jnp.max(dots, axis=-1, keepdims=True)
        e = jnp.exp(dots)
        a = e * pl.reciprocal(jnp.sum(e, axis=-1, keepdims=True), approx=True)
        head_outs.append(
            jnp.dot(a.astype(jnp.bfloat16), vh, preferred_element_type=jnp.float32))
    ctx = jnp.concatenate(head_outs, axis=-1)                       # (N, E)

    # single fused output projection (N,E)@(E,E)
    attn = jnp.dot(ctx.astype(jnp.bfloat16), wo_ref[0],
                   preferred_element_type=jnp.float32) + bo_ref[0]

    y = _layernorm(attn + x, ln1g_ref[0], ln1b_ref[0])

    # ---------------- feed-forward (NewGELU) ----------------
    h1 = jnp.dot(y.astype(jnp.bfloat16), wf1_ref[0],
                 preferred_element_type=jnp.float32) + bf1_ref[0]
    h1 = _new_gelu(h1)
    h2 = jnp.dot(h1.astype(jnp.bfloat16), wf2_ref[0],
                 preferred_element_type=jnp.float32) + bf2_ref[0]

    z = _layernorm(h2 + y, ln2g_ref[0], ln2b_ref[0])

    xc_ref[...] = z                                    # carry to next layer

    @pl.when(layer == pl.num_programs(1) - 1)
    def _():
        o_ref[0] = z.astype(o_ref.dtype)


def transformer_forward(x, params, num_heads):
    B, N, E = x.shape
    depth = params["wqkv"].shape[0]
    scale = float(E // num_heads) ** -0.5
    kern = functools.partial(transformer_kernel, num_heads=num_heads, scale=scale)

    def stacked(arr):
        # weight arrays are (depth, ...); select the layer with the inner grid axis
        block = (1,) + arr.shape[1:]
        nzero = len(arr.shape) - 1
        return pl.BlockSpec(block, lambda b, l, n=nzero: (l,) + (0,) * n)

    weight_names = ["wqkv", "bqkv", "wo", "bo", "ln1g", "ln1b",
                    "wf1", "bf1", "wf2", "bf2", "ln2g", "ln2b"]
    weight_args = [params[k] for k in weight_names]

    return pl.pallas_call(
        kern,
        out_shape=jax.ShapeDtypeStruct((B, N, E), x.dtype),
        grid=(B, depth),
        in_specs=[pl.BlockSpec((1, N, E), lambda b, l: (b, 0, 0))]
                 + [stacked(w) for w in weight_args],
        out_specs=pl.BlockSpec((1, N, E), lambda b, l: (b, 0, 0)),
        scratch_shapes=[pltpu.VMEM((N, E), jnp.float32)],
        compiler_params=pltpu.CompilerParams(
            dimension_semantics=("parallel", "arbitrary"),
            vmem_limit_bytes=48 * 1024 * 1024),
    )(x, *weight_args)


# ---------------------------------------------------------------------------
# deterministic synthetic parameters (weights bf16, biases / LN params f32),
# stacked over depth so the whole layer stack is one pallas_call.
# ---------------------------------------------------------------------------
def init_params(key, cfg):
    E, H, depth = cfg["emb_size"], cfg["hidden_dim"], cfg["depth"]
    bf16, f32 = jnp.bfloat16, jnp.float32

    def nrm(k, shape, dtype, s=0.02):
        return (s * jax.random.normal(k, shape)).astype(dtype)

    ks = iter(jax.random.split(key, 8))
    return {
        "wqkv": nrm(next(ks), (depth, E, 3 * E), bf16),
        "bqkv": nrm(next(ks), (depth, 1, 3 * E), f32),
        "wo":   nrm(next(ks), (depth, E, E), bf16),
        "bo":   nrm(next(ks), (depth, 1, E), f32),
        "ln1g": jnp.ones((depth, 1, E), f32),
        "ln1b": jnp.zeros((depth, 1, E), f32),
        "wf1":  nrm(next(ks), (depth, E, H), bf16),
        "bf1":  nrm(next(ks), (depth, 1, H), f32),
        "wf2":  nrm(next(ks), (depth, H, E), bf16),
        "bf2":  nrm(next(ks), (depth, 1, E), f32),
        "ln2g": jnp.ones((depth, 1, E), f32),
        "ln2b": jnp.zeros((depth, 1, E), f32),
    }


if __name__ == "__main__":
    # Transformer operates on token embeddings (B, N, E)
    cfg = dict(emb_size=32, num_heads=4, depth=2, hidden_dim=64)
    B, N = 2, 16

    key = jax.random.PRNGKey(0)
    k_x, k_p = jax.random.split(key)
    x = jax.random.normal(k_x, (B, N, cfg["emb_size"]), dtype=jnp.float32)
    params = init_params(k_p, cfg)

    out = transformer_forward(x, params, cfg["num_heads"])
    jax.block_until_ready(out)
    assert out.shape == (B, N, cfg["emb_size"])
    assert bool(jnp.all(jnp.isfinite(out)))
    print("KERNEL_OK")
</pallas_src>

<mosaic_0001>
module attributes {stable_mosaic.version = 11 : i64} {
  func.func @transformer_kernel(%arg0: i32, %arg1: i32, %arg2: memref<1x16x32xf32, #tpu.memory_space<vmem>>, %arg3: memref<1x32x96xbf16, #tpu.memory_space<vmem>>, %arg4: memref<1x1x96xf32, #tpu.memory_space<vmem>>, %arg5: memref<1x32x32xbf16, #tpu.memory_space<vmem>>, %arg6: memref<1x1x32xf32, #tpu.memory_space<vmem>>, %arg7: memref<1x1x32xf32, #tpu.memory_space<vmem>>, %arg8: memref<1x1x32xf32, #tpu.memory_space<vmem>>, %arg9: memref<1x32x64xbf16, #tpu.memory_space<vmem>>, %arg10: memref<1x1x64xf32, #tpu.memory_space<vmem>>, %arg11: memref<1x64x32xbf16, #tpu.memory_space<vmem>>, %arg12: memref<1x1x32xf32, #tpu.memory_space<vmem>>, %arg13: memref<1x1x32xf32, #tpu.memory_space<vmem>>, %arg14: memref<1x1x32xf32, #tpu.memory_space<vmem>>, %arg15: memref<1x16x32xf32, #tpu.memory_space<vmem>>, %arg16: memref<16x32xf32, #tpu.memory_space<vmem>>) attributes {dimension_semantics = [#tpu.dimension_semantics<parallel>, #tpu.dimension_semantics<arbitrary>], iteration_bounds = array<i64: 2, 2>, scalar_prefetch = 0 : i64, scratch_operands = 1 : i64, tpu.core_type = #tpu.core_type<tc>, window_params = [{transform_indices = @transform_0, window_bounds = array<i64: 1, 16, 32>}, {transform_indices = @transform_1, window_bounds = array<i64: 1, 32, 96>}, {transform_indices = @transform_2, window_bounds = array<i64: 1, 1, 96>}, {transform_indices = @transform_3, window_bounds = array<i64: 1, 32, 32>}, {transform_indices = @transform_4, window_bounds = array<i64: 1, 1, 32>}, {transform_indices = @transform_5, window_bounds = array<i64: 1, 1, 32>}, {transform_indices = @transform_6, window_bounds = array<i64: 1, 1, 32>}, {transform_indices = @transform_7, window_bounds = array<i64: 1, 32, 64>}, {transform_indices = @transform_8, window_bounds = array<i64: 1, 1, 64>}, {transform_indices = @transform_9, window_bounds = array<i64: 1, 64, 32>}, {transform_indices = @transform_10, window_bounds = array<i64: 1, 1, 32>}, {transform_indices = @transform_11, window_bounds = array<i64: 1, 1, 32>}, {transform_indices = @transform_12, window_bounds = array<i64: 1, 1, 32>}, {transform_indices = @transform_13, window_bounds = array<i64: 1, 16, 32>}]} {
    %c0_i32 = arith.constant 0 : i32
    %0 = arith.cmpi eq, %arg1, %c0_i32 : i32
    %1 = arith.extui %0 : i1 to i32
    %c0_i32_0 = arith.constant 0 : i32
    %2 = arith.cmpi ne, %1, %c0_i32_0 : i32
    scf.if %2 {
      %c0_78 = arith.constant 0 : index
      %c0_79 = arith.constant 0 : index
      %c0_80 = arith.constant 0 : index
      %192 = vector.load %arg2[%c0_78, %c0_79, %c0_80] : memref<1x16x32xf32, #tpu.memory_space<vmem>>, vector<1x16x32xf32>
      %193 = vector.shape_cast %192 : vector<1x16x32xf32> to vector<16x32xf32>
      %c0_81 = arith.constant 0 : index
      %c0_82 = arith.constant 0 : index
      %194 = vector.load %arg16[%c0_81, %c0_82] : memref<16x32xf32, #tpu.memory_space<vmem>>, vector<16x32xf32>
      tpu.vector_store %arg16[%c0_81, %c0_82], %193 {strides = array<i32>} : memref<16x32xf32, #tpu.memory_space<vmem>>, vector<16x32xf32>,
    } else {
    }
    %c0 = arith.constant 0 : index
    %c0_1 = arith.constant 0 : index
    %3 = vector.load %arg16[%c0, %c0_1] : memref<16x32xf32, #tpu.memory_space<vmem>>, vector<16x32xf32>
    %4 = arith.truncf %3 : vector<16x32xf32> to vector<16x32xbf16>
    %c0_2 = arith.constant 0 : index
    %c0_3 = arith.constant 0 : index
    %c0_4 = arith.constant 0 : index
    %5 = vector.load %arg3[%c0_2, %c0_3, %c0_4] : memref<1x32x96xbf16, #tpu.memory_space<vmem>>, vector<1x32x96xbf16>
    %6 = vector.shape_cast %5 : vector<1x32x96xbf16> to vector<32x96xbf16>
    %cst = arith.constant dense<0.000000e+00> : vector<16x96xf32>
    %7 = tpu.matmul %4, %6, %cst {dimension_numbers = #tpu.dot_dimension_numbers<[1], [0], [0], [1], [0, 0, 1, 1], [], []>} : vector<16x32xbf16>, vector<32x96xbf16>, vector<16x96xf32> -> vector<16x96xf32>
    %c0_5 = arith.constant 0 : index
    %c0_6 = arith.constant 0 : index
    %c0_7 = arith.constant 0 : index
    %8 = vector.load %arg4[%c0_5, %c0_6, %c0_7] : memref<1x1x96xf32, #tpu.memory_space<vmem>>, vector<1x1x96xf32>
    %9 = vector.shape_cast %8 : vector<1x1x96xf32> to vector<1x96xf32>
    %10 = vector.broadcast %9 : vector<1x96xf32> to vector<16x96xf32>
    %11 = arith.addf %7, %10 : vector<16x96xf32>
    %12 = vector.extract_strided_slice %11 {offsets = [0, 0], sizes = [16, 8], strides = [1, 1]} : vector<16x96xf32> to vector<16x8xf32>
    %13 = arith.truncf %12 : vector<16x8xf32> to vector<16x8xbf16>
    %14 = vector.extract_strided_slice %11 {offsets = [0, 32], sizes = [16, 8], strides = [1, 1]} : vector<16x96xf32> to vector<16x8xf32>
    %15 = arith.truncf %14 : vector<16x8xf32> to vector<16x8xbf16>
    %16 = vector.extract_strided_slice %11 {offsets = [0, 64], sizes = [16, 8], strides = [1, 1]} : vector<16x96xf32> to vector<16x8xf32>
    %17 = arith.truncf %16 : vector<16x8xf32> to vector<16x8xbf16>
    %cst_8 = arith.constant dense<0.000000e+00> : vector<16x16xf32>
    %18 = tpu.matmul %13, %15, %cst_8 {dimension_numbers = #tpu.dot_dimension_numbers<[1], [1], [0], [0], [0, 0, 1, 0], [], []>} : vector<16x8xbf16>, vector<16x8xbf16>, vector<16x16xf32> -> vector<16x16xf32>
    %cst_9 = arith.constant 0.353553385 : f32
    %19 = vector.broadcast %cst_9 : f32 to vector<16x16xf32>
    %20 = arith.mulf %18, %19 : vector<16x16xf32>
    %cst_10 = arith.constant dense<0xFF800000> : vector<16xf32>
    %21 = vector.multi_reduction <maximumf>, %20, %cst_10 [1] : vector<16x16xf32> to vector<16xf32>
    %22 = vector.shape_cast %21 : vector<16xf32> to vector<16x1xf32>
    %23 = vector.broadcast %22 : vector<16x1xf32> to vector<16x16xf32>
    %24 = arith.subf %20, %23 : vector<16x16xf32>
    %25 = math.exp %24 : vector<16x16xf32>
    %cst_11 = arith.constant dense<0.000000e+00> : vector<16xf32>
    %26 = vector.multi_reduction <add>, %25, %cst_11 [1] : vector<16x16xf32> to vector<16xf32>
    %27 = vector.shape_cast %26 : vector<16xf32> to vector<16x1xf32>
    %28 = tpu.reciprocal %27 {approx = true} : vector<16x1xf32> -> vector<16x1xf32>
    %29 = vector.broadcast %28 : vector<16x1xf32> to vector<16x16xf32>
    %30 = arith.mulf %25, %29 : vector<16x16xf32>
    %31 = arith.truncf %30 : vector<16x16xf32> to vector<16x16xbf16>
    %cst_12 = arith.constant dense<0.000000e+00> : vector<16x8xf32>
    %32 = tpu.matmul %31, %17, %cst_12 {dimension_numbers = #tpu.dot_dimension_numbers<[1], [0], [0], [1], [0, 0, 1, 1], [], []>} : vector<16x16xbf16>, vector<16x8xbf16>, vector<16x8xf32> -> vector<16x8xf32>
    %33 = vector.extract_strided_slice %11 {offsets = [0, 8], sizes = [16, 8], strides = [1, 1]} : vector<16x96xf32> to vector<16x8xf32>
    %34 = arith.truncf %33 : vector<16x8xf32> to vector<16x8xbf16>
    %35 = vector.extract_strided_slice %11 {offsets = [0, 40], sizes = [16, 8], strides = [1, 1]} : vector<16x96xf32> to vector<16x8xf32>
    %36 = arith.truncf %35 : vector<16x8xf32> to vector<16x8xbf16>
    %37 = vector.extract_strided_slice %11 {offsets = [0, 72], sizes = [16, 8], strides = [1, 1]} : vector<16x96xf32> to vector<16x8xf32>
    %38 = arith.truncf %37 : vector<16x8xf32> to vector<16x8xbf16>
    %cst_13 = arith.constant dense<0.000000e+00> : vector<16x16xf32>
    %39 = tpu.matmul %34, %36, %cst_13 {dimension_numbers = #tpu.dot_dimension_numbers<[1], [1], [0], [0], [0, 0, 1, 0], [], []>} : vector<16x8xbf16>, vector<16x8xbf16>, vector<16x16xf32> -> vector<16x16xf32>
    %cst_14 = arith.constant 0.353553385 : f32
    %40 = vector.broadcast %cst_14 : f32 to vector<16x16xf32>
    %41 = arith.mulf %39, %40 : vector<16x16xf32>
    %cst_15 = arith.constant dense<0xFF800000> : vector<16xf32>
    %42 = vector.multi_reduction <maximumf>, %41, %cst_15 [1] : vector<16x16xf32> to vector<16xf32>
    %43 = vector.shape_cast %42 : vector<16xf32> to vector<16x1xf32>
    %44 = vector.broadcast %43 : vector<16x1xf32> to vector<16x16xf32>
    %45 = arith.subf %41, %44 : vector<16x16xf32>
    %46 = math.exp %45 : vector<16x16xf32>
    %cst_16 = arith.constant dense<0.000000e+00> : vector<16xf32>
    %47 = vector.multi_reduction <add>, %46, %cst_16 [1] : vector<16x16xf32> to vector<16xf32>
    %48 = vector.shape_cast %47 : vector<16xf32> to vector<16x1xf32>
    %49 = tpu.reciprocal %48 {approx = true} : vector<16x1xf32> -> vector<16x1xf32>
    %50 = vector.broadcast %49 : vector<16x1xf32> to vector<16x16xf32>
    %51 = arith.mulf %46, %50 : vector<16x16xf32>
    %52 = arith.truncf %51 : vector<16x16xf32> to vector<16x16xbf16>
    %cst_17 = arith.constant dense<0.000000e+00> : vector<16x8xf32>
    %53 = tpu.matmul %52, %38, %cst_17 {dimension_numbers = #tpu.dot_dimension_numbers<[1], [0], [0], [1], [0, 0, 1, 1], [], []>} : vector<16x16xbf16>, vector<16x8xbf16>, vector<16x8xf32> -> vector<16x8xf32>
    %54 = vector.extract_strided_slice %11 {offsets = [0, 16], sizes = [16, 8], strides = [1, 1]} : vector<16x96xf32> to vector<16x8xf32>
    %55 = arith.truncf %54 : vector<16x8xf32> to vector<16x8xbf16>
    %56 = vector.extract_strided_slice %11 {offsets = [0, 48], sizes = [16, 8], strides = [1, 1]} : vector<16x96xf32> to vector<16x8xf32>
    %57 = arith.truncf %56 : vector<16x8xf32> to vector<16x8xbf16>
    %58 = vector.extract_strided_slice %11 {offsets = [0, 80], sizes = [16, 8], strides = [1, 1]} : vector<16x96xf32> to vector<16x8xf32>
    %59 = arith.truncf %58 : vector<16x8xf32> to vector<16x8xbf16>
    %cst_18 = arith.constant dense<0.000000e+00> : vector<16x16xf32>
    %60 = tpu.matmul %55, %57, %cst_18 {dimension_numbers = #tpu.dot_dimension_numbers<[1], [1], [0], [0], [0, 0, 1, 0], [], []>} : vector<16x8xbf16>, vector<16x8xbf16>, vector<16x16xf32> -> vector<16x16xf32>
    %cst_19 = arith.constant 0.353553385 : f32
    %61 = vector.broadcast %cst_19 : f32 to vector<16x16xf32>
    %62 = arith.mulf %60, %61 : vector<16x16xf32>
    %cst_20 = arith.constant dense<0xFF800000> : vector<16xf32>
    %63 = vector.multi_reduction <maximumf>, %62, %cst_20 [1] : vector<16x16xf32> to vector<16xf32>
    %64 = vector.shape_cast %63 : vector<16xf32> to vector<16x1xf32>
    %65 = vector.broadcast %64 : vector<16x1xf32> to vector<16x16xf32>
    %66 = arith.subf %62, %65 : vector<16x16xf32>
    %67 = math.exp %66 : vector<16x16xf32>
    %cst_21 = arith.constant dense<0.000000e+00> : vector<16xf32>
    %68 = vector.multi_reduction <add>, %67, %cst_21 [1] : vector<16x16xf32> to vector<16xf32>
    %69 = vector.shape_cast %68 : vector<16xf32> to vector<16x1xf32>
    %70 = tpu.reciprocal %69 {approx = true} : vector<16x1xf32> -> vector<16x1xf32>
    %71 = vector.broadcast %70 : vector<16x1xf32> to vector<16x16xf32>
    %72 = arith.mulf %67, %71 : vector<16x16xf32>
    %73 = arith.truncf %72 : vector<16x16xf32> to vector<16x16xbf16>
    %cst_22 = arith.constant dense<0.000000e+00> : vector<16x8xf32>
    %74 = tpu.matmul %73, %59, %cst_22 {dimension_numbers = #tpu.dot_dimension_numbers<[1], [0], [0], [1], [0, 0, 1, 1], [], []>} : vector<16x16xbf16>, vector<16x8xbf16>, vector<16x8xf32> -> vector<16x8xf32>
    %75 = vector.extract_strided_slice %11 {offsets = [0, 24], sizes = [16, 8], strides = [1, 1]} : vector<16x96xf32> to vector<16x8xf32>
    %76 = arith.truncf %75 : vector<16x8xf32> to vector<16x8xbf16>
    %77 = vector.extract_strided_slice %11 {offsets = [0, 56], sizes = [16, 8], strides = [1, 1]} : vector<16x96xf32> to vector<16x8xf32>
    %78 = arith.truncf %77 : vector<16x8xf32> to vector<16x8xbf16>
    %79 = vector.extract_strided_slice %11 {offsets = [0, 88], sizes = [16, 8], strides = [1, 1]} : vector<16x96xf32> to vector<16x8xf32>
    %80 = arith.truncf %79 : vector<16x8xf32> to vector<16x8xbf16>
    %cst_23 = arith.constant dense<0.000000e+00> : vector<16x16xf32>
    %81 = tpu.matmul %76, %78, %cst_23 {dimension_numbers = #tpu.dot_dimension_numbers<[1], [1], [0], [0], [0, 0, 1, 0], [], []>} : vector<16x8xbf16>, vector<16x8xbf16>, vector<16x16xf32> -> vector<16x16xf32>
    %cst_24 = arith.constant 0.353553385 : f32
    %82 = vector.broadcast %cst_24 : f32 to vector<16x16xf32>
    %83 = arith.mulf %81, %82 : vector<16x16xf32>
    %cst_25 = arith.constant dense<0xFF800000> : vector<16xf32>
    %84 = vector.multi_reduction <maximumf>, %83, %cst_25 [1] : vector<16x16xf32> to vector<16xf32>
    %85 = vector.shape_cast %84 : vector<16xf32> to vector<16x1xf32>
    %86 = vector.broadcast %85 : vector<16x1xf32> to vector<16x16xf32>
    %87 = arith.subf %83, %86 : vector<16x16xf32>
    %88 = math.exp %87 : vector<16x16xf32>
    %cst_26 = arith.constant dense<0.000000e+00> : vector<16xf32>
    %89 = vector.multi_reduction <add>, %88, %cst_26 [1] : vector<16x16xf32> to vector<16xf32>
    %90 = vector.shape_cast %89 : vector<16xf32> to vector<16x1xf32>
    %91 = tpu.reciprocal %90 {approx = true} : vector<16x1xf32> -> vector<16x1xf32>
    %92 = vector.broadcast %91 : vector<16x1xf32> to vector<16x16xf32>
    %93 = arith.mulf %88, %92 : vector<16x16xf32>
    %94 = arith.truncf %93 : vector<16x16xf32> to vector<16x16xbf16>
    %cst_27 = arith.constant dense<0.000000e+00> : vector<16x8xf32>
    %95 = tpu.matmul %94, %80, %cst_27 {dimension_numbers = #tpu.dot_dimension_numbers<[1], [0], [0], [1], [0, 0, 1, 1], [], []>} : vector<16x16xbf16>, vector<16x8xbf16>, vector<16x8xf32> -> vector<16x8xf32>
    %96 = tpu.concatenate %32, %53, %74, %95 in 1 : vector<16x8xf32>, vector<16x8xf32>, vector<16x8xf32>, vector<16x8xf32> -> vector<16x32xf32>
    %97 = arith.truncf %96 : vector<16x32xf32> to vector<16x32xbf16>
    %c0_28 = arith.constant 0 : index
    %c0_29 = arith.constant 0 : index
    %c0_30 = arith.constant 0 : index
    %98 = vector.load %arg5[%c0_28, %c0_29, %c0_30] : memref<1x32x32xbf16, #tpu.memory_space<vmem>>, vector<1x32x32xbf16>
    %99 = vector.shape_cast %98 : vector<1x32x32xbf16> to vector<32x32xbf16>
    %cst_31 = arith.constant dense<0.000000e+00> : vector<16x32xf32>
    %100 = tpu.matmul %97, %99, %cst_31 {dimension_numbers = #tpu.dot_dimension_numbers<[1], [0], [0], [1], [0, 0, 1, 1], [], []>} : vector<16x32xbf16>, vector<32x32xbf16>, vector<16x32xf32> -> vector<16x32xf32>
    %c0_32 = arith.constant 0 : index
    %c0_33 = arith.constant 0 : index
    %c0_34 = arith.constant 0 : index
    %101 = vector.load %arg6[%c0_32, %c0_33, %c0_34] : memref<1x1x32xf32, #tpu.memory_space<vmem>>, vector<1x1x32xf32>
    %102 = vector.shape_cast %101 : vector<1x1x32xf32> to vector<1x32xf32>
    %103 = vector.broadcast %102 : vector<1x32xf32> to vector<16x32xf32>
    %104 = arith.addf %100, %103 : vector<16x32xf32>
    %105 = arith.addf %104, %3 : vector<16x32xf32>
    %c0_35 = arith.constant 0 : index
    %c0_36 = arith.constant 0 : index
    %c0_37 = arith.constant 0 : index
    %106 = vector.load %arg7[%c0_35, %c0_36, %c0_37] : memref<1x1x32xf32, #tpu.memory_space<vmem>>, vector<1x1x32xf32>
    %107 = vector.shape_cast %106 : vector<1x1x32xf32> to vector<1x32xf32>
    %c0_38 = arith.constant 0 : index
    %c0_39 = arith.constant 0 : index
    %c0_40 = arith.constant 0 : index
    %108 = vector.load %arg8[%c0_38, %c0_39, %c0_40] : memref<1x1x32xf32, #tpu.memory_space<vmem>>, vector<1x1x32xf32>
    %109 = vector.shape_cast %108 : vector<1x1x32xf32> to vector<1x32xf32>
    %cst_41 = arith.constant dense<0.000000e+00> : vector<16xf32>
    %110 = vector.multi_reduction <add>, %105, %cst_41 [1] : vector<16x32xf32> to vector<16xf32>
    %111 = vector.shape_cast %110 : vector<16xf32> to vector<16x1xf32>
    %cst_42 = arith.constant 3.200000e+01 : f32
    %112 = vector.broadcast %cst_42 : f32 to vector<16x1xf32>
    %113 = arith.divf %111, %112 : vector<16x1xf32>
    %114 = vector.broadcast %113 : vector<16x1xf32> to vector<16x32xf32>
    %115 = arith.subf %105, %114 : vector<16x32xf32>
    %116 = arith.mulf %115, %115 : vector<16x32xf32>
    %cst_43 = arith.constant dense<0.000000e+00> : vector<16xf32>
    %117 = vector.multi_reduction <add>, %116, %cst_43 [1] : vector<16x32xf32> to vector<16xf32>
    %118 = vector.shape_cast %117 : vector<16xf32> to vector<16x1xf32>
    %cst_44 = arith.constant 3.200000e+01 : f32
    %119 = vector.broadcast %cst_44 : f32 to vector<16x1xf32>
    %120 = arith.divf %118, %119 : vector<16x1xf32>
    %121 = vector.broadcast %113 : vector<16x1xf32> to vector<16x32xf32>
    %122 = arith.subf %105, %121 : vector<16x32xf32>
    %cst_45 = arith.constant 9.99999974E-6 : f32
    %123 = vector.broadcast %cst_45 : f32 to vector<16x1xf32>
    %124 = arith.addf %120, %123 : vector<16x1xf32>
    %125 = math.rsqrt %124 : vector<16x1xf32>
    %126 = vector.broadcast %125 : vector<16x1xf32> to vector<16x32xf32>
    %127 = arith.mulf %122, %126 : vector<16x32xf32>
    %128 = vector.broadcast %107 : vector<1x32xf32> to vector<16x32xf32>
    %129 = arith.mulf %127, %128 : vector<16x32xf32>
    %130 = vector.broadcast %109 : vector<1x32xf32> to vector<16x32xf32>
    %131 = arith.addf %129, %130 : vector<16x32xf32>
    %132 = arith.truncf %131 : vector<16x32xf32> to vector<16x32xbf16>
    %c0_46 = arith.constant 0 : index
    %c0_47 = arith.constant 0 : index
    %c0_48 = arith.constant 0 : index
    %133 = vector.load %arg9[%c0_46, %c0_47, %c0_48] : memref<1x32x64xbf16, #tpu.memory_space<vmem>>, vector<1x32x64xbf16>
    %134 = vector.shape_cast %133 : vector<1x32x64xbf16> to vector<32x64xbf16>
    %cst_49 = arith.constant dense<0.000000e+00> : vector<16x64xf32>
    %135 = tpu.matmul %132, %134, %cst_49 {dimension_numbers = #tpu.dot_dimension_numbers<[1], [0], [0], [1], [0, 0, 1, 1], [], []>} : vector<16x32xbf16>, vector<32x64xbf16>, vector<16x64xf32> -> vector<16x64xf32>
    %c0_50 = arith.constant 0 : index
    %c0_51 = arith.constant 0 : index
    %c0_52 = arith.constant 0 : index
    %136 = vector.load %arg10[%c0_50, %c0_51, %c0_52] : memref<1x1x64xf32, #tpu.memory_space<vmem>>, vector<1x1x64xf32>
    %137 = vector.shape_cast %136 : vector<1x1x64xf32> to vector<1x64xf32>
    %138 = vector.broadcast %137 : vector<1x64xf32> to vector<16x64xf32>
    %139 = arith.addf %135, %138 : vector<16x64xf32>
    %cst_53 = arith.constant 5.000000e-01 : f32
    %140 = vector.broadcast %cst_53 : f32 to vector<16x64xf32>
    %141 = arith.mulf %140, %139 : vector<16x64xf32>
    %142 = arith.mulf %139, %139 : vector<16x64xf32>
    %143 = arith.mulf %139, %142 : vector<16x64xf32>
    %cst_54 = arith.constant 4.471500e-02 : f32
    %144 = vector.broadcast %cst_54 : f32 to vector<16x64xf32>
    %145 = arith.mulf %144, %143 : vector<16x64xf32>
    %146 = arith.addf %139, %145 : vector<16x64xf32>
    %cst_55 = arith.constant 0.797884583 : f32
    %147 = vector.broadcast %cst_55 : f32 to vector<16x64xf32>
    %148 = arith.mulf %147, %146 : vector<16x64xf32>
    %149 = math.tanh %148 : vector<16x64xf32>
    %cst_56 = arith.constant 1.000000e+00 : f32
    %150 = vector.broadcast %cst_56 : f32 to vector<16x64xf32>
    %151 = arith.addf %150, %149 : vector<16x64xf32>
    %152 = arith.mulf %141, %151 : vector<16x64xf32>
    %153 = arith.truncf %152 : vector<16x64xf32> to vector<16x64xbf16>
    %c0_57 = arith.constant 0 : index
    %c0_58 = arith.constant 0 : index
    %c0_59 = arith.constant 0 : index
    %154 = vector.load %arg11[%c0_57, %c0_58, %c0_59] : memref<1x64x32xbf16, #tpu.memory_space<vmem>>, vector<1x64x32xbf16>
    %155 = vector.shape_cast %154 : vector<1x64x32xbf16> to vector<64x32xbf16>
    %cst_60 = arith.constant dense<0.000000e+00> : vector<16x32xf32>
    %156 = tpu.matmul %153, %155, %cst_60 {dimension_numbers = #tpu.dot_dimension_numbers<[1], [0], [0], [1], [0, 0, 1, 1], [], []>} : vector<16x64xbf16>, vector<64x32xbf16>, vector<16x32xf32> -> vector<16x32xf32>
    %c0_61 = arith.constant 0 : index
    %c0_62 = arith.constant 0 : index
    %c0_63 = arith.constant 0 : index
    %157 = vector.load %arg12[%c0_61, %c0_62, %c0_63] : memref<1x1x32xf32, #tpu.memory_space<vmem>>, vector<1x1x32xf32>
    %158 = vector.shape_cast %157 : vector<1x1x32xf32> to vector<1x32xf32>
    %159 = vector.broadcast %158 : vector<1x32xf32> to vector<16x32xf32>
    %160 = arith.addf %156, %159 : vector<16x32xf32>
    %161 = arith.addf %160, %131 : vector<16x32xf32>
    %c0_64 = arith.constant 0 : index
    %c0_65 = arith.constant 0 : index
    %c0_66 = arith.constant 0 : index
    %162 = vector.load %arg13[%c0_64, %c0_65, %c0_66] : memref<1x1x32xf32, #tpu.memory_space<vmem>>, vector<1x1x32xf32>
    %163 = vector.shape_cast %162 : vector<1x1x32xf32> to vector<1x32xf32>
    %c0_67 = arith.constant 0 : index
    %c0_68 = arith.constant 0 : index
    %c0_69 = arith.constant 0 : index
    %164 = vector.load %arg14[%c0_67, %c0_68, %c0_69] : memref<1x1x32xf32, #tpu.memory_space<vmem>>, vector<1x1x32xf32>
    %165 = vector.shape_cast %164 : vector<1x1x32xf32> to vector<1x32xf32>
    %cst_70 = arith.constant dense<0.000000e+00> : vector<16xf32>
    %166 = vector.multi_reduction <add>, %161, %cst_70 [1] : vector<16x32xf32> to vector<16xf32>
    %167 = vector.shape_cast %166 : vector<16xf32> to vector<16x1xf32>
    %cst_71 = arith.constant 3.200000e+01 : f32
    %168 = vector.broadcast %cst_71 : f32 to vector<16x1xf32>
    %169 = arith.divf %167, %168 : vector<16x1xf32>
    %170 = vector.broadcast %169 : vector<16x1xf32> to vector<16x32xf32>
    %171 = arith.subf %161, %170 : vector<16x32xf32>
    %172 = arith.mulf %171, %171 : vector<16x32xf32>
    %cst_72 = arith.constant dense<0.000000e+00> : vector<16xf32>
    %173 = vector.multi_reduction <add>, %172, %cst_72 [1] : vector<16x32xf32> to vector<16xf32>
    %174 = vector.shape_cast %173 : vector<16xf32> to vector<16x1xf32>
    %cst_73 = arith.constant 3.200000e+01 : f32
    %175 = vector.broadcast %cst_73 : f32 to vector<16x1xf32>
    %176 = arith.divf %174, %175 : vector<16x1xf32>
    %177 = vector.broadcast %169 : vector<16x1xf32> to vector<16x32xf32>
    %178 = arith.subf %161, %177 : vector<16x32xf32>
    %cst_74 = arith.constant 9.99999974E-6 : f32
    %179 = vector.broadcast %cst_74 : f32 to vector<16x1xf32>
    %180 = arith.addf %176, %179 : vector<16x1xf32>
    %181 = math.rsqrt %180 : vector<16x1xf32>
    %182 = vector.broadcast %181 : vector<16x1xf32> to vector<16x32xf32>
    %183 = arith.mulf %178, %182 : vector<16x32xf32>
    %184 = vector.broadcast %163 : vector<1x32xf32> to vector<16x32xf32>
    %185 = arith.mulf %183, %184 : vector<16x32xf32>
    %186 = vector.broadcast %165 : vector<1x32xf32> to vector<16x32xf32>
    %187 = arith.addf %185, %186 : vector<16x32xf32>
    %c0_75 = arith.constant 0 : index
    %c0_76 = arith.constant 0 : index
    %188 = vector.load %arg16[%c0_75, %c0_76] : memref<16x32xf32, #tpu.memory_space<vmem>>, vector<16x32xf32>
    tpu.vector_store %arg16[%c0_75, %c0_76], %187 {strides = array<i32>} : memref<16x32xf32, #tpu.memory_space<vmem>>, vector<16x32xf32>,
    %c1_i32 = arith.constant 1 : i32
    %189 = arith.cmpi eq, %arg1, %c1_i32 : i32
    %190 = arith.extui %189 : i1 to i32
    %c0_i32_77 = arith.constant 0 : i32
    %191 = arith.cmpi ne, %190, %c0_i32_77 : i32
    scf.if %191 {
      %c0_78 = arith.constant 0 : index
      %c0_79 = arith.constant 0 : index
      %c0_80 = arith.constant 0 : index
      %192 = vector.load %arg15[%c0_78, %c0_79, %c0_80] : memref<1x16x32xf32, #tpu.memory_space<vmem>>, vector<1x16x32xf32>
      %193 = vector.shape_cast %192 : vector<1x16x32xf32> to vector<16x32xf32>
      %194 = vector.shape_cast %187 : vector<16x32xf32> to vector<1x16x32xf32>
      tpu.vector_store %arg15[%c0_78, %c0_79, %c0_80], %194 {strides = array<i32>} : memref<1x16x32xf32, #tpu.memory_space<vmem>>, vector<1x16x32xf32>,
    } else {
    }
    return
  }
  func.func @transform_0(%arg0: i32, %arg1: i32) -> (i32, i32, i32) {
    %c0_i32 = arith.constant 0 : i32
    %c0_i32_0 = arith.constant 0 : i32
    %c0_i32_1 = arith.constant 0 : i32
    return %arg0, %c0_i32, %c0_i32_0 : i32, i32, i32
  }
  func.func @transform_1(%arg0: i32, %arg1: i32) -> (i32, i32, i32) {
    %c0_i32 = arith.constant 0 : i32
    %c0_i32_0 = arith.constant 0 : i32
    %c0_i32_1 = arith.constant 0 : i32
    return %arg1, %c0_i32, %c0_i32_0 : i32, i32, i32
  }
  func.func @transform_2(%arg0: i32, %arg1: i32) -> (i32, i32, i32) {
    %c0_i32 = arith.constant 0 : i32
    %c0_i32_0 = arith.constant 0 : i32
    %c0_i32_1 = arith.constant 0 : i32
    return %arg1, %c0_i32, %c0_i32_0 : i32, i32, i32
  }
  func.func @transform_3(%arg0: i32, %arg1: i32) -> (i32, i32, i32) {
    %c0_i32 = arith.constant 0 : i32
    %c0_i32_0 = arith.constant 0 : i32
    %c0_i32_1 = arith.constant 0 : i32
    return %arg1, %c0_i32, %c0_i32_0 : i32, i32, i32
  }
  func.func @transform_4(%arg0: i32, %arg1: i32) -> (i32, i32, i32) {
    %c0_i32 = arith.constant 0 : i32
    %c0_i32_0 = arith.constant 0 : i32
    %c0_i32_1 = arith.constant 0 : i32
    return %arg1, %c0_i32, %c0_i32_0 : i32, i32, i32
  }
  func.func @transform_5(%arg0: i32, %arg1: i32) -> (i32, i32, i32) {
    %c0_i32 = arith.constant 0 : i32
    %c0_i32_0 = arith.constant 0 : i32
    %c0_i32_1 = arith.constant 0 : i32
    return %arg1, %c0_i32, %c0_i32_0 : i32, i32, i32
  }
  func.func @transform_6(%arg0: i32, %arg1: i32) -> (i32, i32, i32) {
    %c0_i32 = arith.constant 0 : i32
    %c0_i32_0 = arith.constant 0 : i32
    %c0_i32_1 = arith.constant 0 : i32
    return %arg1, %c0_i32, %c0_i32_0 : i32, i32, i32
  }
  func.func @transform_7(%arg0: i32, %arg1: i32) -> (i32, i32, i32) {
    %c0_i32 = arith.constant 0 : i32
    %c0_i32_0 = arith.constant 0 : i32
    %c0_i32_1 = arith.constant 0 : i32
    return %arg1, %c0_i32, %c0_i32_0 : i32, i32, i32
  }
  func.func @transform_8(%arg0: i32, %arg1: i32) -> (i32, i32, i32) {
    %c0_i32 = arith.constant 0 : i32
    %c0_i32_0 = arith.constant 0 : i32
    %c0_i32_1 = arith.constant 0 : i32
    return %arg1, %c0_i32, %c0_i32_0 : i32, i32, i32
  }
  func.func @transform_9(%arg0: i32, %arg1: i32) -> (i32, i32, i32) {
    %c0_i32 = arith.constant 0 : i32
    %c0_i32_0 = arith.constant 0 : i32
    %c0_i32_1 = arith.constant 0 : i32
    return %arg1, %c0_i32, %c0_i32_0 : i32, i32, i32
  }
  func.func @transform_10(%arg0: i32, %arg1: i32) -> (i32, i32, i32) {
    %c0_i32 = arith.constant 0 : i32
    %c0_i32_0 = arith.constant 0 : i32
    %c0_i32_1 = arith.constant 0 : i32
    return %arg1, %c0_i32, %c0_i32_0 : i32, i32, i32
  }
  func.func @transform_11(%arg0: i32, %arg1: i32) -> (i32, i32, i32) {
    %c0_i32 = arith.constant 0 : i32
    %c0_i32_0 = arith.constant 0 : i32
    %c0_i32_1 = arith.constant 0 : i32
    return %arg1, %c0_i32, %c0_i32_0 : i32, i32, i32
  }
  func.func @transform_12(%arg0: i32, %arg1: i32) -> (i32, i32, i32) {
    %c0_i32 = arith.constant 0 : i32
    %c0_i32_0 = arith.constant 0 : i32
    %c0_i32_1 = arith.constant 0 : i32
    return %arg1, %c0_i32, %c0_i32_0 : i32, i32, i32
  }
  func.func @transform_13(%arg0: i32, %arg1: i32) -> (i32, i32, i32) {
    %c0_i32 = arith.constant 0 : i32
    %c0_i32_0 = arith.constant 0 : i32
    %c0_i32_1 = arith.constant 0 : i32
    return %arg0, %c0_i32, %c0_i32_0 : i32, i32, i32
  }
}

</mosaic_0001>

<bundles_post_ra>
// kernel: tpu_custom_call.1
= control target key start
LH: loop header
LB: loop body
LE: loop exit
PB: predicated region body
PF: predicated region fallthrough
CT: control target
= control target key end

     0   :  { %s2663_s0 = inlined_call_operand.vmem [shape: f32[2,16,32], index: 0, kind: input, shape index: {}]   ;;  %s2664_s1 = inlined_call_operand.vmem [shape: bf16[2,32,96], index: 1, kind: input, shape index: {}]   ;;  %s2665_s2 = inlined_call_operand.hbm [shape: f32[2,1,96], index: 2, kind: input, shape index: {}]   ;;  %s2666_s3 = inlined_call_operand.vmem [shape: bf16[2,32,32], index: 3, kind: input, shape index: {}]   ;;  %s2667_s4 = inlined_call_operand.vmem [shape: f32[2,1,32], index: 4, kind: input, shape index: {}]   ;;  %s2668_s5 = inlined_call_operand.hbm [shape: f32[2,1,32], index: 5, kind: input, shape index: {}]   ;;  %s2669_s6 = inlined_call_operand.vmem [shape: f32[2,1,32], index: 6, kind: input, shape index: {}]   ;;  %s2670_s7 = inlined_call_operand.hbm [shape: bf16[2,32,64], index: 7, kind: input, shape index: {}]   ;;  %s2671_s8 = inlined_call_operand.vmem [shape: f32[2,1,64], index: 8, kind: input, shape index: {}]   ;;  %s2672_s9 = inlined_call_operand.vmem [shape: bf16[2,64,32], index: 9, kind: input, shape index: {}]   ;;  %s2673_s10 = inlined_call_operand.vmem [shape: f32[2,1,32], index: 10, kind: input, shape index: {}]   ;;  %s2674_s11 = inlined_call_operand.hbm [shape: f32[2,1,32], index: 11, kind: input, shape index: {}]   ;;  %s2675_s12 = inlined_call_operand.vmem [shape: f32[2,1,32], index: 12, kind: input, shape index: {}]   ;;  %s2676_s13 = inlined_call_operand.hbm [shape: f32[2,16,32], index: 13, kind: output, shape index: {}]  }
   0x1   :  { %2692 = sst [smem:[#allocation29_spill]] %s2663_s0 }
   0x2   :  { %2693 = sst [smem:[#allocation30_spill]] %s2664_s1 }
   0x3   :  { %2694 = sst [smem:[#allocation31_spill]] %s2665_s2 }
   0x4   :  { %2695 = sst [smem:[#allocation32_spill]] %s2666_s3 }
   0x5   :  { %2696 = sst [smem:[#allocation33_spill]] %s2667_s4 }
   0x6   :  { %2697 = sst [smem:[#allocation34_spill]] %s2668_s5 }
   0x7   :  { %2698 = sst [smem:[#allocation35_spill]] %s2669_s6 }
   0x8   :  { %2699 = sst [smem:[#allocation36_spill]] %s2670_s7 }
   0x9   :  { %2700 = sst [smem:[#allocation37_spill]] %s2671_s8 }
   0xa   :  { %2701 = sst [smem:[#allocation38_spill]] %s2672_s9 }
   0xb   :  { %2702 = sst [smem:[#allocation39_spill]] %s2673_s10 }
   0xc   :  { %2703 = sst [smem:[#allocation40_spill]] %s2674_s11 }
   0xd   :  { %2704 = sst [smem:[#allocation41_spill]] %s2675_s12 }
   0xe   :  { %2705 = sst [smem:[#allocation42_spill]] %s2676_s13 }
   0xf   :  { %18 = vsyncpa [#allocation4], 0 }
  0x10   :  { %20 = vsyncpa [#allocation4 + $0x1], 0 }
  0x11   :  { %21 = vsyncpa [#allocation7], 0 }
  0x12   :  { %23 = vsyncpa [#allocation7 + $0x1], 0 }
  0x13   :  { %24 = vsyncpa [#allocation10], 0 }
  0x14   :  { %26 = vsyncpa [#allocation10 + $0x1], 0 }
  0x15   :  { %27 = vsyncpa [#allocation5], 0 }
  0x16   :  { %29 = vsyncpa [#allocation5 + $0x1], 0  ;;  %s2249_s25 = smov 0   ;;  %s2251_s26 = smov 0  }
  0x17   :  { %s2253_s27 = smov 0   ;;  %s2255_s28 = smov 0  }
  0x18   :  { %s2257_s29 = smov 0   ;;  %s2259_s30 = smov 0  }
  0x19   :  { %s2261_s14 = smov 0   ;;  %s2263_s15 = smov 0  }
  0x1a   :  { %s2265_s16 = smov 0   ;;  %s2267_s17 = smov 0  }
  0x1b   :  { %s2269_s18 = smov 0  }
  0x1c LB: > { %2706 = sst [smem:[#allocation16_spill]] %s2119_s25  ;;  %s2303_s19 = sadd.s32 4294967295, %s2159_s18   ;;  %s2159_s18 = sphi %s2269_s18, %s35_s18   ;;  %s2155_s17 = sphi %s2267_s17, %s2761_s17   ;;  %s2151_s16 = sphi %s2265_s16, %s2760_s16   ;;  %s2147_s15 = sphi %s2263_s15, %s2759_s15   ;;  %s2143_s14 = sphi %s2261_s14, %s2758_s14   ;;  %s2139_s30 = sphi %s2259_s30, %s2757_s30   ;;  %s2135_s29 = sphi %s2257_s29, %s2756_s29   ;;  %s2131_s28 = sphi %s2255_s28, %s2755_s28   ;;  %s2127_s27 = sphi %s2253_s27, %s2754_s27   ;;  %s2123_s26 = sphi %s2251_s26, %s2763_s26   ;;  %s2119_s25 = sphi %s2249_s25, %s2762_s25  }
  0x1d   : > { %2707 = sst [smem:[#allocation17_spill]] %s2127_s27  ;;  %s1613_s20 = sadd.s32 4294967294, %s2159_s18  }
  0x1e   : > { %2708 = sst [smem:[#allocation18_spill]] %s2135_s29  ;;  %s44_s21 = sadd.s32 1, %s2151_s16 }
  0x1f   : > { %2709 = sst [smem:[#allocation19_spill]] %s2139_s30  ;;  %s47_s22 = sadd.s32 1, %s2155_s17 }
  0x20   : > { %2710 = sst [smem:[#allocation20_spill]] %s2151_s16  ;;  %p45_p0 = scmp.ge.s32.totalorder %s44_s21, 2 }
  0x21   : > { %2711 = sst [smem:[#allocation21_spill]] %s2155_s17  ;;  %s106_s23 = sadd.s32 1, %s2139_s30 }
  0x22   : > { %2712 = sst [smem:[#allocation22_spill]] %s2159_s18  ;;  %p113_p1 = scmp.ne.s32.totalorder %s2139_s30, %s2135_s29 }
  0x23   : > { %p114_p2 = scmp.eq.s32.totalorder %s2159_s18, 0  ;;  %s2765_s21 = smov (%p45_p0, %s44_s21), 0 }
  0x24   : > { %2713 = sst [smem:[#allocation23_spill]] %s2765_s21  ;;  %s2767_s22 = smov (!%p45_p0, %s47_s22), %s2155_s17 }
  0x25   : > { %s103_s24 = ssub.s32 %s2151_s16, %s2765_s21  ;;  %p2317_p3 = por %p114_p2, %p113_p1 }
  0x26   : > { %p49_p4 = scmp.ge.s32.totalorder %s2767_s22, 2  ;;  %p104_p5 = scmp.eq.s32.totalorder %s103_s24, 0 }
  0x27   : > { %p119_p6 = scmp.ne.s32.totalorder %s2135_s29, %s2131_s28  ;;  %p120_p7 = scmp.eq.s32.totalorder %s2303_s19, 0 }
  0x28   : > { %s2769_s22 = smov (%p49_p4, %s2767_s22), 0  ;;  %s392_s9 = sadd.s32 1, %s2127_s27 }
  0x29   : > { %2715 = sst [smem:[#allocation24_spill]] %s2769_s22  ;;  %p2328_p8 = por %p120_p7, %p119_p6 }
  0x2a   : > { %s2326_s12 = scalar_select %p104_p5, %s2139_s30, %s106_s23  }
  0x2b   : > { %s389_s10 = ssub.s32 %s2155_s17, %s2769_s22  ;;  %p402_p10 = scmp.ne.s32.totalorder %s2127_s27, %s2123_s26 }
  0x2c   : > { %2716 = sst [smem:[#allocation25_spill]] %s2326_s12  ;;  %p390_p9 = scmp.eq.s32.totalorder %s389_s10, 0 }
  0x2d   : > { %p403_p11 = scmp.eq.s32.totalorder %s2303_s19, 3  ;;  %p408_p13 = scmp.ne.s32.totalorder %s2123_s26, %s2119_s25 }
  0x2e   : > { %s2339_s28 = scalar_select %p390_p9, %s2127_s27, %s392_s9  }
  0x2f   : > { %p2341_p12 = por %p403_p11, %p402_p10  ;;  %p409_p0 = scmp.eq.s32.totalorder %s1613_s20, 3 }
  0x30   : > { %2718 = sst [smem:[#allocation26_spill]] %s2339_s28  ;;  %p1732_p1 = scmp.lt.s32.totalorder %s2159_s18, 4 }
  0x31   : > { %s2719_s24 = scalar_select %p2341_p12, 1, 0 }
  0x32   : > { %s2349_s23 = sand.u32 1, %s2139_s30   ;;  %p2351_p2 = por %p409_p0, %p408_p13 }
  0x33   : > { %2720 = sst [smem:[#allocation27_spill]] %s2719_s24  ;;  %s476_s22 = sand.u32 1, %s2159_s18  }
  0x34   : > { %s2721_s10 = scalar_select %p2351_p2, 1, 0 }
  0x35   : > { %p2358_p4 = pnand %p1732_p1, %p2317_p3  ;;  %s2724_s5 = sld [smem:[#allocation34_spill]] }
  0x36   : > { %2722 = sst [smem:[#allocation28_spill]] %s2721_s10  ;;  %s479_s30 = scalar_lea.vmem [#allocation6], %s2349_s23 }
  0x37   : > { %s486_s27 = sshll.u32 %s479_s30, 4  ;;  %p1619_p5 = scmp.ge.s32.totalorder %s2159_s18, 1  ;;  %s487_s27 = int_to_ptr.vmem [resolvable:$true] %s486_s27 }
  0x38   : > { %s477_s13 = scalar_lea.sflag [#allocation7], %s476_s22  ;;  %p562_p3 = scmp.lt.s32.totalorder %s2159_s18, 5 }
  0x39   : > { %s2726_s2 = sld [smem:[#allocation31_spill]]  ;;  %s1616_s30 = sshll.u32 %s2349_s23, 4 }
  0x3a   : > { %p2371_p6 = pnand %p1619_p5, %p562_p3  ;;  %s446_s22 = scalar_lea.sflag [#allocation4], %s2349_s23 }
  0x3b   : > { %s482_s20 = scalar_lea.hbm %s2724_s5, %s2151_s16  ;;  %s448_s5 = scalar_lea.vmem [#allocation3], %s2349_s23 }
  0x3c   : > { %s484_s28 = sshll.u32 %s482_s20, 4  ;;  %s455_s25 = sshll.u32 %s448_s5, 4  ;;  %s485_s28 = int_to_ptr.hbm [resolvable:$true] %s484_s28  ;;  %s456_s25 = int_to_ptr.vmem [resolvable:$true] %s455_s25 }
  0x3d   : > { %1721 = dma.hbm_to_vmem [thread:$0]  (!%p2358_p4), %s485_s28, 16, %s487_s27, %s477_s13  }
  0x3e   : > { %s1689_s27 = sshll.u32 %s2151_s16, 4  ;;  %s2727_s7 = sld [smem:[#allocation36_spill]] }
  0x3f   : > { %s451_s20 = scalar_lea.hbm %s2726_s2, %s2151_s16  ;;  %s503_s12 = scalar_lea.vmem [#allocation8], %s1616_s30 }
  0x40   : > { %s453_s24 = sshll.u32 %s451_s20, 4  ;;  %s511_s17 = sshll.u32 %s503_s12, 4  ;;  %s454_s24 = int_to_ptr.hbm [resolvable:$true] %s453_s24  ;;  %s512_s17 = int_to_ptr.vmem [resolvable:$true] %s511_s17 }
  0x41   : > { %1718 = dma.hbm_to_vmem [thread:$0]  (!%p2358_p4), %s454_s24, 16, %s456_s25, %s446_s22  }
  0x42   : > { %s2161_s20 = smov 64   ;;  %s2162_s2 = smov 4  }
  0x43   : > { %s2728_s11 = sld [smem:[#allocation40_spill]]  ;;  %s544_s22 = scalar_lea.vmem [#allocation9], %s2349_s23 }
  0x44   : > { %s508_s8 = scalar_lea.hbm %s2727_s7, %s1689_s27  ;;  %s551_s3 = sshll.u32 %s544_s22, 4  ;;  %s552_s3 = int_to_ptr.vmem [resolvable:$true] %s551_s3 }
  0x45   : > { %s509_s5 = sshll.u32 %s508_s8, 4  ;;  %s542_s18 = scalar_lea.sflag [#allocation10], %s2349_s23  ;;  %s510_s5 = int_to_ptr.hbm [resolvable:$true] %s509_s5 }
  0x46   : > { %1724 = dma.hbm_to_vmem [thread:$0]  (!%p2358_p4), %s510_s5, 256, %s512_s17, %s477_s13, %s2161_s20, %s2161_s20, %s2162_s2  }
  0x47   : > { %566 = sbr.rel (%p2371_p6) target bundleno = 2065 (0x811), region = 72  ;;  %s2401_s8 = sand.u32 (!%p2371_p6), 1, %s2135_s29  }
  0x48   : > { %s569_s2 = scalar_lea.sflag (!%p2371_p6), [#allocation4], %s2401_s8 }
  0x49   : > { %s547_s25 = scalar_lea.hbm %s2728_s11, %s2151_s16 }
  0x4a   : > { %s549_s24 = sshll.u32 %s547_s25, 4  ;;  %s550_s24 = int_to_ptr.hbm [resolvable:$true] %s549_s24 }
  0x4b   : > { %1727 = dma.hbm_to_vmem [thread:$0]  (!%p2358_p4), %s550_s24, 16, %s552_s3, %s542_s18  }
  0x4c   : > { %2102 = dma.done.wait (%p2328_p8), %s569_s2, 16  }
  0x4d   : > { %2104 = vsyncadd (%p2328_p8), %s569_s2, 4294967280  ;;  %s577_s3 = sand.u32 1, %s2303_s19  }
  0x4e   : > { %s578_s6 = scalar_lea.sflag [#allocation7], %s577_s3 }
  0x4f   : > { %2106 = dma.done.wait (%p2328_p8), %s578_s6, 272  }
  0x50   : > { %2108 = vsyncadd (%p2328_p8), %s578_s6, 4294967024  ;;  %s1620_s10 = sshll.u32 %s2401_s8, 4  ;;  %s597_s13 = scalar_lea.sflag [#allocation10], %s2401_s8 }
  0x51   : > { %s2416_s9 = scalar_lea.vmem [#allocation8], %s1620_s10 }
  0x52   : > { %2110 = dma.done.wait (%p2328_p8), %s597_s13, 16  }
  0x53   : > { %2112 = vsyncadd (%p2328_p8), %s597_s13, 4294967280  ;;  %s2689_s19 = sand.u32 1, %s2123_s26   ;;  %p690_p7 = scmp.lt.s32.totalorder %s2147_s15, 1 }
  0x54   : > { %s1621_s27 = sshll.u32 %s2689_s19, 4  ;;  %p695_p9 = scmp.lt.s32.totalorder %s2143_s14, 1 }
  0x55   : > { %s691_s28 = scalar_select %p690_p7, %s2147_s15, 1 }
  0x56   : > { %s2431_s12 = scalar_select %p695_p9, %s2143_s14, 1 }
  0x57   : > { %s1690_s21 = sshll.u32 %s691_s28, 4  ;;  %s2729_s0 = sld [smem:[#allocation29_spill]] }
  0x58   : > { %s1691_s25 = sshll.u32 %s2431_s12, 4  ;;  %s2730_s1 = sld [smem:[#allocation30_spill]] }
  0x59   : > { %s2731_s6 = sld [smem:[#allocation32_spill]]  ;;  %s1693_s16 = sshll.u32 %s2431_s12, 5 }
  0x5a   : > { %s2733_s7 = sld [smem:[#allocation35_spill]]  ;;  %s2471_s4 = scalar_lea.vmem [#allocation11], %s1621_s27 }
  0x5b   : > { %s2734_s5 = sld [smem:[#allocation37_spill]]  ;;  %p1630_p8 = scmp.ne.s32.totalorder %s2143_s14, 0 }
  0x5c   : > { %s2736_s3 = sld [smem:[#allocation39_spill]] }
  0x5d   : > { %s694_s20 = scalar_lea.vmem %s2729_s0, %s1690_s21  ;;  %s2737_s13 = sld [smem:[#allocation41_spill]] }
  0x5e   : > { %s699_s18 = scalar_lea.vmem %s2730_s1, %s1691_s25  ;;  %s2735_s1 = sld [smem:[#allocation38_spill]] }
  0x5f   : > { %s2443_s10 = scalar_lea.vmem %s2731_s6, %s1691_s25 }
  0x60   : > { %s710_s11 = scalar_lea.vmem %s2733_s7, %s2431_s12  ;;  %729 = sbr.rel (%p1630_p8) target bundleno = 104 (0x68), region = 92 }
  0x61   : > { %s713_s0 = scalar_lea.vmem %s2734_s5, %s2431_s12 }
  0x62   : > { %s721_s6 = scalar_lea.vmem %s2736_s3, %s2431_s12 }
  0x63   : > { %s724_s23 = scalar_lea.vmem %s2737_s13, %s2431_s12 }
  0x64   : > { %s2461_s29 = scalar_lea.vmem %s2735_s1, %s1693_s16 }
  0x65   : > { %v730_v0 = vld [vmem:[%s694_s20] sm:$0xff]  ;;  %vm732_vm0 = vcmask 261120   ;;  %v731_v1 = vld [vmem:[%s694_s20 + $0x8] sm:$0xff] }
  0x66   : > { %733 = vst.msk [vmem:[#allocation2] sm:$0xff] %vm732_vm0, %v730_v0 }
  0x67   : > { %734 = vst.msk [vmem:[#allocation2 + $0x8] sm:$0xff] %vm732_vm0, %v731_v1 }
  0x68 PF: > { %v1695_v2 = vld [vmem:[%s699_s18 + $0x8] sm:$0xff]  ;;  %v1694_v3 = vld [vmem:[%s699_s18] sm:$0xff]  ;;  %vm758_vm1 = vcmask 261120   ;;  %s2738_s1 = scalar_lea.vmem [#allocation3], %s2401_s8  ;;  %s2163_s7 = smov 104   ;;  %vm780_vm2 = vcmask 64512  }
  0x69   : > { %768 = vmatpush.bf16.msra.mxu0 %v1695_v2  ;;  %v1855_v8 = vld [vmem:[%s2738_s1] ss:$0 sm:$0xff]  ;;  %s2164_s16 = smov 120   ;;  %s2165_s27 = smov 96   ;;  %vm803_vm3 = vcmask 130048   ;;  %vm1082_vm4 = vcmask 195584  }
  0x6a   : > { %s2166_s20 = smov 80   ;;  %s2167_s18 = smov 72   ;;  %vm1281_vm12 = vcmask 523264  }
  0x6b   : > { %s2168_s28 = smov 88   ;;  %s2169_s17 = smov 112  }
  0x6c   : > { %s2170_s21 = smov 64   ;;  %s2171_s5 = smov 56  }
  0x6d   : > { %v2474_v4 = vld [vmem:[#allocation2] sm:$0xff]  ;;  %769 = vmatpush.bf16.msra.mxu0 %v1694_v3  ;;  %s2172_s24 = smov 40   ;;  %s2173_s22 = smov 48  }
  0x6e   : > { %v2476_v5 = vld [vmem:[#allocation2 + $0x8] sm:$0xff]  ;;  %s2174_s25 = smov 8   ;;  %s2175_s2 = smov 24  }
  0x6f   : > { %v737_v6 = vpack.c.bf16 %v2476_v5, %v2474_v4  ;;  %s2176_s3 = smov 16   ;;  %s2739_s30 = sld [smem:[#allocation33_spill]] }
  0x70   : > { %p1683_p10 = scmp.ne.s32.totalorder %s2143_s14, 1 }
  0x71   : > { %1639 = vmatmul.msk.bf16.vlgmr.msra.gmra.mxu0 %vm758_vm1, %v737_v6 }
  0x75   : > { %s2740_s13 = scalar_lea.vmem %s2739_s30, %s2431_s12 }
  0xee   : > { %v771_v7 = vpop.f32.mrf.mxu0 }
  0xef   : > { %v772_v10 = vadd.f32 %v1855_v8, %v771_v7 }
  0xf6   : > { %v773_v9 = vpop.f32.mrf.mxu0 }
  0xf7   : > { %v774_v11 = vadd.f32 %v1855_v8, %v773_v9 }
  0xf9   : > { %v2483_v12 = vpack.c.bf16 %v774_v11, %v772_v10 }
  0xfb   : > { %985 = vrot.lane.b32.xlu2 %v2483_v12, %s2163_s7  ;;  %847 = vrot.lane.b32.xlu1 %v2483_v12, %s2164_s16 }
  0xfc   : > { %778 = vrot.lane.b32.xlu0 %v2483_v12, %s2165_s27 }
 0x103   : > { %918 = vrot.lane.b32.xlu2 %v2483_v12, %s2166_s20  ;;  %987 = vrot.lane.b32.xlu1 %v2483_v12, %s2167_s18 }
 0x104   : > { %849 = vrot.lane.b32.xlu0 %v2483_v12, %s2168_s28 }
 0x10c   : > { %916 = vrot.lane.b32.xlu0 %v2483_v12, %s2169_s17 }
 0x155   : > { %v986_v13 = vpop.permute.xlu2 %985 }
 0x15d   : > { %v919_v14 = vpop.permute.xlu2 %918 }
 0x15e   : > { %v924_v15 = vsel %vm780_vm2, %v919_v14, 0 }
 0x15f   : > { %933 = vmatpush.bf16.xpose.msrb.mxu0 %v924_v15 }
 0x16d   : > { %v848_v16 = vpop.permute.xlu1 %847 }
 0x16e   : > { %v779_v17 = vpop.permute.xlu0 %778 }
 0x16f   : > { %v785_v18 = vsel %vm780_vm2, %v779_v17, 0 }
 0x170   : > { %794 = vmatpush.bf16.xpose.msra.mxu1 %v785_v18 }
 0x175   : > { %v988_v19 = vpop.permute.xlu1 %987 }
 0x176   : > { %v850_v20 = vpop.permute.xlu0 %849  ;;  %v993_v21 = vsel %vm780_vm2, %v988_v19, 0 }
 0x177   : > { %1640 = vmatmul.msk.bf16.vlgmr.msra.gmra.mxu1 %vm780_vm2, %v2483_v12  ;;  %v855_v22 = vsel %vm780_vm2, %v850_v20, 0 }
 0x178   : > { %864 = vmatpush.bf16.xpose.msra.mxu3 %v855_v22 }
 0x17e   : > { %v917_v23 = vpop.permute.xlu0 %916 }
 0x17f   : > { %1642 = vmatmul.msk.bf16.vlgmr.msra.gmra.mxu3 %vm780_vm2, %v848_v16  ;;  %1644 = vmatmul.msk.bf16.vlgmr.msrb.gmra.mxu0 %vm780_vm2, %v917_v23 }
 0x180   : > { %1002 = vmatpush.bf16.xpose.msrb.mxu3 %v993_v21 }
 0x18f   : > { %1646 = vmatmul.msk.bf16.vlgmr.msrb.gmra.mxu3 %vm780_vm2, %v986_v13 }
 0x1f4   : > { %v796_v24 = vpop.f32.mrf.mxu1 }
 0x1f5   : > { %v801_v25 = vmul.f32 0.35355338, %v796_v24 }
 0x1f7   : > { %v804_v26 = vsel %vm803_vm3, %v801_v25, -inf }
 0x1f8   : > { %805 = vmax.xlane.f32.xlu1 %v804_v26 }
 0x1fc   : > { %v798_v27 = vpop.f32.mrf.mxu1  ;;  %v935_v28 = vpop.f32.mrf.mxu0 }
 0x1fd   : > { %v802_v29 = vmul.f32 0.35355338, %v798_v27  ;;  %v940_v30 = vmul.f32 0.35355338, %v935_v28 }
 0x1ff   : > { %v807_v31 = vsel %vm803_vm3, %v802_v29, -inf  ;;  %v942_v32 = vsel %vm803_vm3, %v940_v30, -inf }
 0x200   : > { %808 = vmax.xlane.f32.xlu2 %v807_v31  ;;  %943 = vmax.xlane.f32.xlu0 %v942_v32 }
 0x202   : > { %v866_v33 = vpop.f32.mrf.mxu3 }
 0x203   : > { %v871_v34 = vmul.f32 0.35355338, %v866_v33 }
 0x204   : > { %v937_v35 = vpop.f32.mrf.mxu0 }
 0x205   : > { %v941_v36 = vmul.f32 0.35355338, %v937_v35  ;;  %v873_v37 = vsel %vm803_vm3, %v871_v34, -inf }
 0x207   : > { %v945_v38 = vsel %vm803_vm3, %v941_v36, -inf }
 0x208   : > { %874 = vmax.xlane.f32.xlu0 %v873_v37  ;;  %946 = vmax.xlane.f32.xlu1 %v945_v38 }
 0x20a   : > { %v868_v39 = vpop.f32.mrf.mxu3 }
 0x20b   : > { %v872_v40 = vmul.f32 0.35355338, %v868_v39 }
 0x20d   : > { %v876_v41 = vsel %vm803_vm3, %v872_v40, -inf }
 0x20e   : > { %877 = vmax.xlane.f32.xlu2 %v876_v41 }
 0x212   : > { %v1004_v42 = vpop.f32.mrf.mxu3 }
 0x213   : > { %v1009_v43 = vmul.f32 0.35355338, %v1004_v42 }
 0x215   : > { %v1011_v44 = vsel %vm803_vm3, %v1009_v43, -inf }
 0x216   : > { %1012 = vmax.xlane.f32.xlu1 %v1011_v44 }
 0x21a   : > { %v1006_v45 = vpop.f32.mrf.mxu3 }
 0x21b   : > { %v1010_v46 = vmul.f32 0.35355338, %v1006_v45 }
 0x21d   : > { %v1014_v47 = vsel %vm803_vm3, %v1010_v46, -inf }
 0x21e   : > { %1015 = vmax.xlane.f32.xlu2 %v1014_v47 }
 0x22f   : > { %827 = vrot.lane.b32.xlu1 %v2483_v12, %s2170_s21 }
 0x236   : > { %896 = vrot.lane.b32.xlu2 %v2483_v12, %s2171_s5 }
 0x26b   : > { %v806_v48 = vpop.xlane.xlu1 %805 }
 0x26c   : > { %v810_v49 = vsub.f32 %v801_v25, %v806_v48 }
 0x26e   : > { %v812_v50 = vmul.f32 1.442695, %v810_v49 }
 0x270   : > { %1863 = vpow2.f32 %v812_v50 }
 0x273   : > { %v809_v51 = vpop.xlane.xlu2 %808  ;;  %v944_v52 = vpop.xlane.xlu0 %943 }
 0x274   : > { %v811_v53 = vsub.f32 %v802_v29, %v809_v51  ;;  %v948_v54 = vsub.f32 %v940_v30, %v944_v52 }
 0x276   : > { %v2511_v55 = vpop.eup %1863  ;;  %v814_v56 = vmul.f32 1.442695, %v811_v53  ;;  %v950_v57 = vmul.f32 1.442695, %v948_v54 }
 0x277   : > { %v816_v58 = vsel %vm803_vm3, %v2511_v55, 0.0 }
 0x278   : > { %1865 = vpow2.f32 %v814_v56  ;;  %817 = vadd.xlane.f32.xlu2 %v816_v58 }
 0x279   : > { %1867 = vpow2.f32 %v950_v57 }
 0x27b   : > { %v875_v59 = vpop.xlane.xlu0 %874  ;;  %v947_v60 = vpop.xlane.xlu1 %946 }
 0x27c   : > { %v879_v61 = vsub.f32 %v871_v34, %v875_v59  ;;  %v949_v62 = vsub.f32 %v941_v36, %v947_v60 }
 0x27e   : > { %v1866_v63 = vpop.eup %1865  ;;  %v881_v0 = vmul.f32 1.442695, %v879_v61  ;;  %v952_v1 = vmul.f32 1.442695, %v949_v62 }
 0x27f   : > { %v2515_v2 = vpop.eup %1867  ;;  %v819_v3 = vsel %vm803_vm3, %v1866_v63, 0.0 }
 0x280   : > { %1869 = vpow2.f32 %v881_v0  ;;  %820 = vadd.xlane.f32.xlu0 %v819_v3  ;;  %v954_v6 = vsel %vm803_vm3, %v2515_v2, 0.0 }
 0x281   : > { %1871 = vpow2.f32 %v952_v1  ;;  %955 = vadd.xlane.f32.xlu1 %v954_v6  ;;  %v878_v7 = vpop.xlane.xlu2 %877 }
 0x282   : > { %v880_v8 = vsub.f32 %v872_v40, %v878_v7  ;;  %v1697_v7 = vld [vmem:[%s2443_s10 + $0x8] sm:$0xff] }
 0x283   : > { %1115 = vmatpush.bf16.msra.mxu0 %v1697_v7 }
 0x284   : > { %v883_v9 = vmul.f32 1.442695, %v880_v8  ;;  %v1696_v8 = vld [vmem:[%s2443_s10] sm:$0xff] }
 0x286   : > { %v1870_v10 = vpop.eup %1869  ;;  %1873 = vpow2.f32 %v883_v9 }
 0x287   : > { %v2520_v11 = vpop.eup %1871  ;;  %v885_v13 = vsel %vm803_vm3, %v1870_v10, 0.0  ;;  %1116 = vmatpush.bf16.msra.mxu0 %v1696_v8 }
 0x288   : > { %886 = vadd.xlane.f32.xlu2 %v885_v13  ;;  %v957_v14 = vsel %vm803_vm3, %v2520_v11, 0.0 }
 0x289   : > { %958 = vadd.xlane.f32.xlu0 %v957_v14  ;;  %v1013_v15 = vpop.xlane.xlu1 %1012 }
 0x28a   : > { %v1017_v16 = vsub.f32 %v1009_v43, %v1013_v15 }
 0x28c   : > { %v1019_v17 = vmul.f32 1.442695, %v1017_v16  ;;  %v1874_v18 = vpop.eup %1873 }
 0x28d   : > { %v888_v19 = vsel %vm803_vm3, %v1874_v18, 0.0 }
 0x28e   : > { %1875 = vpow2.f32 %v1019_v17 }
 0x291   : > { %889 = vadd.xlane.f32.xlu0 %v888_v19  ;;  %v1016_v20 = vpop.xlane.xlu2 %1015 }
 0x292   : > { %v1018_v21 = vsub.f32 %v1010_v46, %v1016_v20 }
 0x294   : > { %v1021_v22 = vmul.f32 1.442695, %v1018_v21  ;;  %v1876_v23 = vpop.eup %1875 }
 0x295   : > { %v1023_v24 = vsel %vm803_vm3, %v1876_v23, 0.0 }
 0x296   : > { %1877 = vpow2.f32 %v1021_v22 }
 0x299   : > { %1024 = vadd.xlane.f32.xlu0 %v1023_v24  ;;  %v897_v28 = vpop.permute.xlu2 %896 }
 0x29c   : > { %v1878_v25 = vpop.eup %1877 }
 0x29d   : > { %v1026_v26 = vsel %vm803_vm3, %v1878_v25, 0.0 }
 0x2a0   : > { %1034 = vrot.lane.b32.xlu2 %v2483_v12, %s2172_s24 }
 0x2a1   : > { %1027 = vadd.xlane.f32.xlu0 %v1026_v26  ;;  %v828_v27 = vpop.permute.xlu1 %827  ;;  %v1856_v26 = vld [vmem:[%s2740_s13] ss:$0 sm:$0xff] }
 0x2a2   : > { %840 = vmatpush.bf16.msra.mxu2 %v828_v27 }
 0x2a6   : > { %909 = vmatpush.bf16.msrb.mxu2 %v897_v28 }
 0x2b5   : > { %965 = vrot.lane.b32.xlu0 %v2483_v12, %s2173_s22 }
 0x2eb   : > { %v818_v29 = vpop.xlane.xlu2 %817 }
 0x2ec   : > { %1879 = vrcp.f32 %v818_v29 }
 0x2f2   : > { %v1880_v31 = vpop.eup %1879 }
 0x2f3   : > { %v821_v30 = vpop.xlane.xlu0 %820  ;;  %v824_v34 = vmul.f32 %v1880_v31, %v2511_v55 }
 0x2f4   : > { %1881 = vrcp.f32 %v821_v30  ;;  %v956_v48 = vpop.xlane.xlu1 %955 }
 0x2fa   : > { %v1882_v32 = vpop.eup %1881 }
 0x2fb   : > { %v887_v33 = vpop.xlane.xlu2 %886  ;;  %v825_v35 = vmul.f32 %v1882_v32, %v1866_v63 }
 0x2fc   : > { %v959_v36 = vpop.xlane.xlu0 %958  ;;  %1883 = vrcp.f32 %v887_v33 }
 0x2fd   : > { %v826_v37 = vpack.c.bf16 %v825_v35, %v824_v34  ;;  %v2177_v35 = vmov 32.0  }
 0x2ff   : > { %1641 = vmatmul.msk.bf16.vlgmr.msra.gmra.mxu2 %vm803_vm3, %v826_v37 }
 0x302   : > { %v1884_v12 = vpop.eup %1883 }
 0x303   : > { %v1035_v38 = vpop.permute.xlu2 %1034  ;;  %v893_v41 = vmul.f32 %v1884_v12, %v1870_v10 }
 0x304   : > { %v890_v39 = vpop.xlane.xlu0 %889  ;;  %1047 = vmatpush.bf16.msra.mxu2 %v1035_v38 }
 0x305   : > { %1885 = vrcp.f32 %v890_v39 }
 0x30b   : > { %v1886_v40 = vpop.eup %1885 }
 0x30c   : > { %v894_v42 = vmul.f32 %v1886_v40, %v1874_v18  ;;  %v1025_v43 = vpop.xlane.xlu0 %1024 }
 0x30d   : > { %1887 = vrcp.f32 %v1025_v43 }
 0x30e   : > { %v895_v44 = vpack.c.bf16 %v894_v42, %v893_v41 }
 0x310   : > { %1643 = vmatmul.msk.bf16.vlgmr.msrb.gmra.mxu2 %vm803_vm3, %v895_v44 }
 0x313   : > { %v1888_v46 = vpop.eup %1887 }
 0x314   : > { %v1028_v45 = vpop.xlane.xlu0 %1027  ;;  %v1031_v49 = vmul.f32 %v1888_v46, %v1876_v23 }
 0x315   : > { %1889 = vrcp.f32 %v1028_v45 }
 0x316   : > { %1891 = vrcp.f32 %v959_v36 }
 0x317   : > { %1893 = vrcp.f32 %v956_v48 }
 0x318   : > { %1895 = vrcp.f32 %v2177_v35 }
 0x31b   : > { %v1890_v47 = vpop.eup %1889 }
 0x31c   : > { %v1032_v50 = vmul.f32 %v1890_v47, %v1878_v25  ;;  %v1892_v52 = vpop.eup %1891 }
 0x31d   : > { %v1894_v53 = vpop.eup %1893  ;;  %v963_v54 = vmul.f32 %v1892_v52, %v2520_v11  ;;  %v1698_v52 = vld [vmem:[%s2416_s9] sm:$0xff] }
 0x31e   : > { %v1033_v51 = vpack.c.bf16 %v1032_v50, %v1031_v49  ;;  %v962_v55 = vmul.f32 %v1894_v53, %v2515_v2  ;;  %v1896_v36 = vpop.eup %1895  ;;  %v1699_v49 = vld [vmem:[%s2416_s9 + $0x8] sm:$0xff]  ;;  %s2741_s9 = scalar_lea.vmem [#allocation6], %s2401_s8 }
 0x31f   : > { %v1134_v37 = vmul.f32 32.0, %v1896_v36  ;;  %vm1138_vm5 = vweird.f32 %v1896_v36  ;;  %v1857_v7 = vld [vmem:[%s2741_s9] ss:$0 sm:$0xff] }
 0x320   : > { %1647 = vmatmul.msk.bf16.vlgmr.msra.gmra.mxu2 %vm803_vm3, %v1033_v51  ;;  %v964_v57 = vpack.c.bf16 %v963_v54, %v962_v55 }
 0x321   : > { %v1135_v38 = vsub.f32 1.0, %v1134_v37 }
 0x323   : > { %v1136_v39 = vmul.f32 %v1896_v36, %v1135_v38 }
 0x325   : > { %v1137_v12 = vadd.f32 %v1896_v36, %v1136_v39 }
 0x327   : > { %v966_v56 = vpop.permute.xlu0 %965 }
 0x328   : > { %978 = vmatpush.bf16.msrb.mxu1 %v966_v56 }
 0x32b   : > { %1645 = vmatmul.msk.bf16.vlgmr.msrb.gmra.mxu1 %vm803_vm3, %v964_v57 }
 0x32c   : > { %1218 = vmatpush.bf16.msra.mxu1 %v1699_v49 }
 0x330   : > { %1219 = vmatpush.bf16.msra.mxu1 %v1698_v52 }
 0x382   : > { %v842_v58 = vpop.f32.mrf.mxu2 }
 0x38a   : > { %v844_v59 = vpop.f32.mrf.mxu2 }
 0x393   : > { %v911_v60 = vpop.f32.mrf.mxu2 }
 0x39b   : > { %v913_v61 = vpop.f32.mrf.mxu2 }
 0x39c   : > { %v1840_v62 = vpack.i.bf16 %v913_v61, %v911_v60 }
 0x39e   : > { %1841 = vrot.lane.b32.xlu2 %v1840_v62, %s2174_s25 }
 0x3a3   : > { %v1049_v63 = vpop.f32.mrf.mxu2 }
 0x3a8   : > { %v980_v0 = vpop.f32.mrf.mxu1 }
 0x3ab   : > { %v1051_v1 = vpop.f32.mrf.mxu2 }
 0x3ac   : > { %v1850_v3 = vpack.i.bf16 %v1051_v1, %v1049_v63 }
 0x3ae   : > { %1851 = vrot.lane.b32.xlu0 %v1850_v3, %s2175_s2 }
 0x3b0   : > { %v982_v2 = vpop.f32.mrf.mxu1 }
 0x3b1   : > { %v1845_v6 = vpack.i.bf16 %v982_v2, %v980_v0 }
 0x3b3   : > { %1846 = vrot.lane.b32.xlu2 %v1845_v6, %s2176_s3 }
 0x3f8   : > { %v1842_v9 = vpop.permute.xlu2 %1841 }
 0x3f9   : > { %v1844_v11 = vunpack.i.h.bf16 %v1842_v9  ;;  %v1843_v13 = vunpack.i.l.bf16 %v1842_v9 }
 0x3fb   : > { %v1079_v17 = vsel %vm780_vm2, %v844_v59, %v1844_v11  ;;  %v1078_v18 = vsel %vm780_vm2, %v842_v58, %v1843_v13  ;;  %v1858_v11 = vld [vmem:[%s710_s11] ss:$0 sm:$0xff] }
 0x40d   : > { %v1847_v10 = vpop.permute.xlu2 %1846 }
 0x40e   : > { %v1849_v14 = vunpack.i.h.bf16 %v1847_v10  ;;  %v1848_v15 = vunpack.i.l.bf16 %v1847_v10 }
 0x410   : > { %v1081_v21 = vsel %vm803_vm3, %v1079_v17, %v1849_v14  ;;  %v1080_v22 = vsel %vm803_vm3, %v1078_v18, %v1848_v15 }
 0x420   : > { %v1852_v16 = vpop.permute.xlu0 %1851 }
 0x421   : > { %v1854_v19 = vunpack.i.h.bf16 %v1852_v16  ;;  %v1853_v20 = vunpack.i.l.bf16 %v1852_v16 }
 0x423   : > { %v1083_v23 = vsel %vm1082_vm4, %v1080_v22, %v1853_v20  ;;  %v1084_v24 = vsel %vm1082_vm4, %v1081_v21, %v1854_v19  ;;  %v1703_v19 = vld [vmem:[%s2461_s29 + $0x18] sm:$0xff]  ;;  %v1702_v20 = vld [vmem:[%s2461_s29 + $0x10] sm:$0xff]  ;;  %v1701_v21 = vld [vmem:[%s2461_s29 + $0x8] sm:$0xff] }
 0x424   : > { %v1085_v25 = vpack.c.bf16 %v1084_v24, %v1083_v23  ;;  %1289 = vmatpush.bf16.msra.mxu3 %v1703_v19  ;;  %v1859_v22 = vld [vmem:[%s713_s0] ss:$0 sm:$0xff] }
 0x425   : > { %v1700_v23 = vld [vmem:[%s2461_s29] sm:$0xff] }
 0x426   : > { %1656 = vmatmul.msk.bf16.vlgmr.msra.gmra.mxu0 %vm758_vm1, %v1085_v25 }
 0x428   : > { %1290 = vmatpush.bf16.msra.mxu3 %v1702_v20 }
 0x42c   : > { %1291 = vmatpush.bf16.msra.mxu3 %v1701_v21 }
 0x430   : > { %1292 = vmatpush.bf16.msra.mxu3 %v1700_v23 }
 0x4a3   : > { %v1118_v27 = vpop.f32.mrf.mxu0 }
 0x4a4   : > { %v1119_v28 = vadd.f32 %v1856_v26, %v1118_v27 }
 0x4a6   : > { %v1123_v29 = vadd.f32 %v1119_v28, %v2474_v4  ;;  %v2554_v4 = vsel %vm1138_vm5, %v1896_v36, %v1137_v12 }
 0x4a8   : > { %v1127_v30 = vsel %vm758_vm1, %v1123_v29, 0.0 }
 0x4a9   : > { %1128 = vadd.xlane.f32.xlu2 %v1127_v30 }
 0x4ab   : > { %v1120_v31 = vpop.f32.mrf.mxu0 }
 0x4ac   : > { %v1121_v32 = vadd.f32 %v1856_v26, %v1120_v31 }
 0x4ae   : > { %v1124_v33 = vadd.f32 %v1121_v32, %v2476_v5 }
 0x4b0   : > { %v1130_v34 = vsel %vm758_vm1, %v1124_v33, 0.0 }
 0x4b1   : > { %1131 = vadd.xlane.f32.xlu1 %v1130_v34 }
 0x51c   : > { %v1129_v40 = vpop.xlane.xlu2 %1128 }
 0x51d   : > { %v1140_v41 = vmul.f32 %v2554_v4, %v1129_v40 }
 0x51f   : > { %v1142_v42 = vsub.f32 %v1123_v29, %v1140_v41 }
 0x521   : > { %v1144_v5 = vmul.f32 %v1142_v42, %v1142_v42 }
 0x523   : > { %v1146_v43 = vsel %vm758_vm1, %v1144_v5, 0.0 }
 0x524   : > { %v1132_v44 = vpop.xlane.xlu1 %1131  ;;  %1147 = vadd.xlane.f32.xlu0 %v1146_v43 }
 0x525   : > { %v1141_v45 = vmul.f32 %v2554_v4, %v1132_v44 }
 0x527   : > { %v1143_v46 = vsub.f32 %v1124_v33, %v1141_v45  ;;  %v1860_v45 = vld [vmem:[%s721_s6] ss:$0 sm:$0xff]  ;;  %s2745_s6 = scalar_lea.vmem [#allocation9], %s2401_s8 }
 0x529   : > { %v1145_v47 = vmul.f32 %v1143_v46, %v1143_v46 }
 0x52b   : > { %v1149_v48 = vsel %vm758_vm1, %v1145_v47, 0.0 }
 0x52c   : > { %1150 = vadd.xlane.f32.xlu1 %v1149_v48 }
 0x597   : > { %v1148_v50 = vpop.xlane.xlu0 %1147 }
 0x598   : > { %v1152_v51 = vmul.f32 %v1148_v50, %v2554_v4 }
 0x59a   : > { %v1154_v53 = vadd.f32 1e-05, %v1152_v51 }
 0x59c   : > { %1897 = vrsqrt.f32 %v1154_v53  ;;  %vm1162_vm7 = vweird.f32 %v1154_v53 }
 0x59f   : > { %v1151_v54 = vpop.xlane.xlu1 %1150 }
 0x5a0   : > { %v1153_v55 = vmul.f32 %v1151_v54, %v2554_v4 }
 0x5a2   : > { %v1898_v56 = vpop.eup %1897  ;;  %v1155_v57 = vadd.f32 1e-05, %v1153_v55 }
 0x5a3   : > { %v1157_v58 = vmul.f32 %v1898_v56, %v1154_v53  ;;  %vm1163_vm6 = vweird.f32 %v1898_v56 }
 0x5a4   : > { %1899 = vrsqrt.f32 %v1155_v57  ;;  %vm1164_vm8 = vmor %vm1162_vm7, %vm1163_vm6  ;;  %vm1172_vm10 = vweird.f32 %v1155_v57 }
 0x5a5   : > { %v1158_v59 = vmul.f32 %v1898_v56, %v1157_v58 }
 0x5a7   : > { %v1159_v60 = vmul.f32 0.5, %v1158_v59 }
 0x5a9   : > { %v1160_v61 = vsub.f32 1.5, %v1159_v60 }
 0x5aa   : > { %v1900_v62 = vpop.eup %1899 }
 0x5ab   : > { %v1161_v63 = vmul.f32 %v1898_v56, %v1160_v61  ;;  %v1167_v0 = vmul.f32 %v1900_v62, %v1155_v57  ;;  %vm1173_vm9 = vweird.f32 %v1900_v62 }
 0x5ac   : > { %vm1174_vm11 = vmor %vm1172_vm10, %vm1173_vm9 }
 0x5ad   : > { %v1168_v1 = vmul.f32 %v1900_v62, %v1167_v0  ;;  %v1165_v3 = vsel %vm1164_vm8, %v1898_v56, %v1161_v63 }
 0x5ae   : > { %v1176_v8 = vmul.f32 %v1165_v3, %v1142_v42 }
 0x5af   : > { %v1169_v2 = vmul.f32 0.5, %v1168_v1 }
 0x5b0   : > { %v1181_v13 = vmul.f32 %v1857_v7, %v1176_v8 }
 0x5b1   : > { %v1170_v6 = vsub.f32 1.5, %v1169_v2 }
 0x5b2   : > { %v1186_v16 = vadd.f32 %v1858_v11, %v1181_v13 }
 0x5b3   : > { %v1171_v9 = vmul.f32 %v1900_v62, %v1170_v6 }
 0x5b5   : > { %v1175_v10 = vsel %vm1174_vm11, %v1900_v62, %v1171_v9 }
 0x5b6   : > { %v1177_v14 = vmul.f32 %v1175_v10, %v1143_v46 }
 0x5b8   : > { %v1182_v15 = vmul.f32 %v1857_v7, %v1177_v14 }
 0x5ba   : > { %v1187_v17 = vadd.f32 %v1858_v11, %v1182_v15 }
 0x5bc   : > { %v1188_v18 = vpack.c.bf16 %v1187_v17, %v1186_v16 }
 0x5be   : > { %1665 = vmatmul.msk.bf16.vlgmr.msra.gmra.mxu1 %vm758_vm1, %v1188_v18 }
 0x63b   : > { %v1221_v24 = vpop.f32.mrf.mxu1 }
 0x63c   : > { %v1222_v25 = vadd.f32 %v1859_v22, %v1221_v24 }
 0x63e   : > { %v1228_v26 = vmul.f32 %v1222_v25, %v1222_v25  ;;  %v1226_v40 = vmul.f32 0.5, %v1222_v25 }
 0x640   : > { %v1230_v27 = vmul.f32 %v1228_v26, %v1222_v25 }
 0x642   : > { %v1232_v28 = vmul.f32 0.044715, %v1230_v27 }
 0x643   : > { %v1223_v29 = vpop.f32.mrf.mxu1 }
 0x644   : > { %v1234_v30 = vadd.f32 %v1232_v28, %v1222_v25  ;;  %v1224_v31 = vadd.f32 %v1859_v22, %v1223_v29 }
 0x646   : > { %v1229_v32 = vmul.f32 %v1224_v31, %v1224_v31  ;;  %v1236_v33 = vmul.f32 0.7978846, %v1234_v30  ;;  %v1227_v41 = vmul.f32 0.5, %v1224_v31 }
 0x648   : > { %v1231_v34 = vmul.f32 %v1229_v32, %v1224_v31  ;;  %1901 = vtanh.f32 %v1236_v33 }
 0x64a   : > { %v1233_v35 = vmul.f32 0.044715, %v1231_v34 }
 0x64c   : > { %v1235_v36 = vadd.f32 %v1233_v35, %v1224_v31 }
 0x64e   : > { %v1237_v37 = vmul.f32 0.7978846, %v1235_v36  ;;  %v1902_v38 = vpop.eup %1901 }
 0x64f   : > { %v1240_v39 = vadd.f32 1.0, %v1902_v38 }
 0x650   : > { %1903 = vtanh.f32 %v1237_v37 }
 0x651   : > { %v1242_v5 = vmul.f32 %v1240_v39, %v1226_v40 }
 0x656   : > { %v1904_v12 = vpop.eup %1903 }
 0x657   : > { %v1241_v42 = vadd.f32 1.0, %v1904_v12 }
 0x659   : > { %v1243_v43 = vmul.f32 %v1241_v42, %v1227_v41 }
 0x65b   : > { %v1244_v44 = vpack.c.bf16 %v1243_v43, %v1242_v5 }
 0x65d   : > { %1682 = vmatmul.msk.bf16.vlgmr.msra.gmra.mxu3 %vm1281_vm12, %v1244_v44 }
 0x6e0   : > { %v1294_v46 = vpop.f32.mrf.mxu3 }
 0x6e1   : > { %v1295_v47 = vadd.f32 %v1860_v45, %v1294_v46 }
 0x6e3   : > { %v1299_v48 = vadd.f32 %v1295_v47, %v1186_v16 }
 0x6e5   : > { %v1303_v49 = vsel %vm758_vm1, %v1299_v48, 0.0 }
 0x6e6   : > { %1304 = vadd.xlane.f32.xlu1 %v1303_v49 }
 0x6e8   : > { %v1296_v50 = vpop.f32.mrf.mxu3 }
 0x6e9   : > { %v1297_v51 = vadd.f32 %v1860_v45, %v1296_v50 }
 0x6eb   : > { %v1300_v52 = vadd.f32 %v1297_v51, %v1187_v17  ;;  %v1861_v17 = vld [vmem:[%s2745_s6] ss:$0 sm:$0xff] }
 0x6ed   : > { %v1306_v53 = vsel %vm758_vm1, %v1300_v52, 0.0 }
 0x6ee   : > { %1307 = vadd.xlane.f32.xlu1 %v1306_v53 }
 0x759   : > { %v1305_v54 = vpop.xlane.xlu1 %1304 }
 0x75a   : > { %v1309_v55 = vmul.f32 %v1305_v54, %v2554_v4 }
 0x75c   : > { %v1311_v56 = vsub.f32 %v1299_v48, %v1309_v55 }
 0x75e   : > { %v1313_v57 = vmul.f32 %v1311_v56, %v1311_v56 }
 0x760   : > { %v1315_v58 = vsel %vm758_vm1, %v1313_v57, 0.0 }
 0x761   : > { %1316 = vadd.xlane.f32.xlu1 %v1315_v58  ;;  %v1308_v59 = vpop.xlane.xlu1 %1307 }
 0x762   : > { %v1310_v60 = vmul.f32 %v1308_v59, %v2554_v4 }
 0x764   : > { %v1312_v61 = vsub.f32 %v1300_v52, %v1310_v60 }
 0x766   : > { %v1314_v62 = vmul.f32 %v1312_v61, %v1312_v61 }
 0x768   : > { %v1318_v63 = vsel %vm758_vm1, %v1314_v62, 0.0 }
 0x769   : > { %1319 = vadd.xlane.f32.xlu2 %v1318_v63 }
 0x7d4   : > { %v1317_v0 = vpop.xlane.xlu1 %1316 }
 0x7d5   : > { %v1321_v1 = vmul.f32 %v1317_v0, %v2554_v4 }
 0x7d7   : > { %v1323_v3 = vadd.f32 1e-05, %v1321_v1 }
 0x7d9   : > { %1905 = vrsqrt.f32 %v1323_v3  ;;  %vm1331_vm14 = vweird.f32 %v1323_v3 }
 0x7dc   : > { %v1320_v2 = vpop.xlane.xlu2 %1319 }
 0x7dd   : > { %v1322_v6 = vmul.f32 %v1320_v2, %v2554_v4  ;;  %v1862_v4 = vld [vmem:[%s724_s23] ss:$0 sm:$0xff] }
 0x7df   : > { %v1906_v7 = vpop.eup %1905  ;;  %v1324_v8 = vadd.f32 1e-05, %v1322_v6 }
 0x7e0   : > { %v1326_v9 = vmul.f32 %v1906_v7, %v1323_v3  ;;  %vm1332_vm13 = vweird.f32 %v1906_v7 }
 0x7e1   : > { %1907 = vrsqrt.f32 %v1324_v8  ;;  %vm1333_vm15 = vmor %vm1331_vm14, %vm1332_vm13  ;;  %vm1341_vm2 = vweird.f32 %v1324_v8 }
 0x7e2   : > { %v1327_v10 = vmul.f32 %v1906_v7, %v1326_v9 }
 0x7e4   : > { %v1328_v11 = vmul.f32 0.5, %v1327_v10 }
 0x7e6   : > { %v1329_v13 = vsub.f32 1.5, %v1328_v11 }
 0x7e7   : > { %v1908_v14 = vpop.eup %1907 }
 0x7e8   : > { %v1330_v15 = vmul.f32 %v1906_v7, %v1329_v13  ;;  %v1336_v16 = vmul.f32 %v1908_v14, %v1324_v8  ;;  %vm1342_vm0 = vweird.f32 %v1908_v14 }
 0x7e9   : > { %vm1343_vm3 = vmor %vm1341_vm2, %vm1342_vm0 }
 0x7ea   : > { %v1334_v18 = vsel %vm1333_vm15, %v1906_v7, %v1330_v15  ;;  %v1337_v19 = vmul.f32 %v1908_v14, %v1336_v16 }
 0x7eb   : > { %v1345_v20 = vmul.f32 %v1334_v18, %v1311_v56 }
 0x7ec   : > { %v1338_v21 = vmul.f32 0.5, %v1337_v19 }
 0x7ed   : > { %v1350_v22 = vmul.f32 %v1861_v17, %v1345_v20 }
 0x7ee   : > { %v1339_v23 = vsub.f32 1.5, %v1338_v21 }
 0x7ef   : > { %v1355_v24 = vadd.f32 %v1862_v4, %v1350_v22 }
 0x7f0   : > { %v1340_v25 = vmul.f32 %v1908_v14, %v1339_v23 }
 0x7f1   : > { %1357 = vst.msk [vmem:[#allocation2] sm:$0xff] %vm758_vm1, %v1355_v24 }
 0x7f2   : > { %v1344_v26 = vsel %vm1343_vm3, %v1908_v14, %v1340_v25 }
 0x7f3   : > { %v1346_v27 = vmul.f32 %v1344_v26, %v1312_v61 }
 0x7f5   : > { %v1351_v28 = vmul.f32 %v1861_v17, %v1346_v27  ;;  %1362 = sbr.rel (%p1683_p10) target bundleno = 2044 (0x7fc), region = 96 }
 0x7f7   : > { %v1356_v29 = vadd.f32 %v1862_v4, %v1351_v28 }
 0x7f9   : > { %1358 = vst.msk [vmem:[#allocation2 + $0x8] sm:$0xff] %vm758_vm1, %v1356_v29 }
 0x7fa   : > { %1363 = vst.msk [vmem:[%s2471_s4] sm:$0xff] %vm758_vm1, %v1355_v24 }
 0x7fb   : > { %1364 = vst.msk [vmem:[%s2471_s4 + $0x8] sm:$0xff] %vm758_vm1, %v1356_v29 }
 0x7fc PF: > { %s1704_s23 = sshll.u32 %s2147_s15, 4  ;;  %s2748_s24 = sld [smem:[#allocation42_spill]] }
 0x7fd   : > { %s1378_s2 = sshll.u32 %s2471_s4, 4  ;;  %s2749_s3 = sand.u32 1, %s2123_s26   ;;  %s1379_s2 = int_to_ptr.vmem [resolvable:$true] %s1378_s2 }
 0x7fe   : > { %s1366_s10 = scalar_lea.sflag [#allocation5], %s2749_s3 }
 0x802   : > { %s1377_s22 = scalar_lea.hbm %s2748_s24, %s1704_s23  ;;  %s2049_s15 = scalar_lea.hbm %s2748_s24, 32 }
 0x803   : > { %s1380_s14 = sshll.u32 %s1377_s22, 4  ;;  %s1381_s14 = int_to_ptr.hbm [resolvable:$true] %s1380_s14 }
 0x804   : > { %s2043_s19 = sshra.s32 %s1381_s14, 4  ;;  %s2044_s19 = int_to_ptr.hbm [resolvable:$true] %s2043_s19 }
 0x805   : > { %s2045_s30 = scalar_lea.hbm %s2044_s19, 16  ;;  %p2050_p1 = scmp.lt.s32.totalorder %s2044_s19, %s2748_s24 }
 0x806   : > { %p2046_p11 = scmp.ne.s32.totalorder %s2044_s19, %s2045_s30  ;;  %p2051_p4 = scmp.lt.s32.totalorder %s2049_s15, %s2045_s30 }
 0x808   : > { %p2047_p13 = pnand %p2046_p11, %p2341_p12  ;;  %p2052_p5 = por %p2051_p4, %p2050_p1 }
 0x80a   : > { %p2048_p0 = pneg %p2047_p13 }
 0x80c   : > { %p2053_p3 = pnand %p2052_p5, %p2048_p0 }
 0x80e   : > { %2056 = shalt.err (!%p2053_p3)
}
 0x80f   : > { %s2178_s4 = smov 128  }
 0x810   : > { %1713 = dma.vmem_to_hbm [thread:$0]  (%p2341_p12), %s1379_s2, 256, %s1381_s14, %s1366_s10, %s2178_s4, %s2178_s4, %s2174_s25  }
 0x811 PF: > { %s2750_s16 = sld [smem:[#allocation22_spill]] }
 0x812   : > { %s2751_s27 = sld [smem:[#allocation16_spill]] }
 0x817   : > { %p1733_p6 = scmp.ge.s32.totalorder %s2750_s16, 2 }
 0x818   : > { %s1395_s18 = sand.u32 1, %s2751_s27  }
 0x819   : > { %p1729_p7 = pnand %p1733_p6, %p2351_p2  ;;  %s1396_s0 = scalar_lea.sflag [#allocation5], %s1395_s18 }
 0x81b   : > { %p1730_p9 = pneg %p1729_p7 }
 0x81d   : > { %2114 = dma.done.wait (%p1730_p9), %s1396_s0, 256  }
 0x81e   : > { %2116 = vsyncadd (%p1730_p9), %s1396_s0, 4294967040  ;;  %s35_s18 = sadd.s32 1, %s2750_s16   ;;  %s2753_s11 = sld [smem:[#allocation17_spill]] }
 0x81f   : > { %p32_p8 = scmp.ge.s32.totalorder %s35_s18, 6   ;;  %s2754_s27 = sld [smem:[#allocation26_spill]] }
 0x820   : > { %s2755_s28 = sld [smem:[#allocation18_spill]]  ;;  %s2762_s25 = smov %s2123_s26 }
 0x821   : > { %s2756_s29 = sld [smem:[#allocation19_spill]] }
 0x822   : > { %s2757_s30 = sld [smem:[#allocation25_spill]]  ;;  %34 = sbr.rel (!%p32_p8) target bundleno = 28 (0x1c), region = 189 }
 0x823   : > { %s2758_s14 = sld [smem:[#allocation20_spill]] }
 0x824   : > { %s2759_s15 = sld [smem:[#allocation21_spill]]  ;;  %s2763_s26 = smov %s2753_s11 }
 0x825   : > { %s2760_s16 = sld [smem:[#allocation23_spill]] }
 0x826   : > { %s2761_s17 = sld [smem:[#allocation24_spill]] }
 0x827   :  { %1402 = vsyncpa [#allocation4], 1 }
 0x828   :  { %1404 = vsyncpa [#allocation4 + $0x1], 1 }
 0x829   :  { %1405 = vsyncpa [#allocation7], 1 }
 0x82a   :  { %1407 = vsyncpa [#allocation7 + $0x1], 1 }
 0x82b   :  { %1408 = vsyncpa [#allocation10], 1 }
 0x82c   :  { %1410 = vsyncpa [#allocation10 + $0x1], 1 }
 0x82d   :  { %1411 = vsyncpa [#allocation5], 1 }
 0x82e   :  { %1413 = vsyncpa [#allocation5 + $0x1], 1 }

</bundles_post_ra>
